<compile_context>
chip_gen: v7x
topology: tpu7x:2x2x1
jax: 0.10.0
libtpu: 0.0.40
codegen_flags: <defaults>
</compile_context>

<pallas_src>
import functools

import jax
import jax.numpy as jnp
from jax.experimental import pallas as pl
from jax.experimental.pallas import tpu as pltpu

DINO_PATCH_SIZE = 14
# Synthetic scaled-down DINOv2 ViT-S/14 config (real: D=384, depth=12, heads=6)
EMBED_DIM = 32
DEPTH = 2
NUM_HEADS = 2
MLP_RATIO = 4
LN_EPS = 1e-6
LANE = 128


# ----------------------------------------------------------------------------
# JAX glue (matches dinov2_crop / conv-patchify semantics exactly)
# ----------------------------------------------------------------------------
def dinov2_crop(x):
    B, C, H, W = x.shape
    pad_h = H % DINO_PATCH_SIZE
    pad_w = W % DINO_PATCH_SIZE
    pad_h1 = pad_h // 2
    pad_h2 = pad_h - pad_h1
    pad_w1 = pad_w // 2
    pad_w2 = pad_w - pad_w1
    return x[:, :, pad_h1:H - pad_h2, pad_w1:W - pad_w2]


def patchify(x):
    # NCHW -> [B, Np, C*P*P], patch flattening order (C, ph, pw) to match a
    # stride-P Conv2d patch embedding with weight [D, C, P, P].
    B, C, H, W = x.shape
    P = DINO_PATCH_SIZE
    Hn, Wn = H // P, W // P
    x = x.reshape(B, C, Hn, P, Wn, P)
    x = x.transpose(0, 2, 4, 1, 3, 5)        # [B, Hn, Wn, C, P, P]
    return x.reshape(B, Hn * Wn, C * P * P)


# ----------------------------------------------------------------------------
# Fused Pallas kernel
# ----------------------------------------------------------------------------
def _norm(v):
    # LayerNorm statistics only; scale/shift are folded into the next matmul.
    mu = jnp.mean(v, axis=-1, keepdims=True)
    var = jnp.mean((v - mu) ** 2, axis=-1, keepdims=True)
    return (v - mu) * jax.lax.rsqrt(var + LN_EPS)


def _make_fused_kernel(batch, n_patches, n_pad):
    D = EMBED_DIM
    Dh = MLP_RATIO * D
    dh = D // NUM_HEADS
    scale = dh ** -0.5
    two_b = 2 * batch
    S = two_b * n_pad                 # all tokens of all 2B sequences
    half = batch * n_pad
    inv_count = 1.0 / float(batch * n_patches * D)   # nn.MSELoss 'mean'

    # Static row offsets into the packed token-constant block.
    ADD_OFF = 0                       # [S, D]   pos + cls + folded patch bias
    MASK_OFF = S                      # [S, S]   block-diag attention bias
    KEEP_OFF = 2 * S                  # [half,D] patch-token mask for the MSE

    # Static row offsets into the packed bias block.
    def QKV_B(d): return d
    def PROJ_B(d): return DEPTH + d
    def FC1_B(d): return 2 * DEPTH + d
    def FC2_B(d): return 3 * DEPTH + d
    NORM_W = 4 * DEPTH
    NORM_B = 4 * DEPTH + 1

    def kernel(patches_ref, pw_ref, tok_ref, bias_ref,
               qkvw_ref, projw_ref, fc1w_ref, fc2w_ref, loss_ref):
        # ---- patch embed ----
        # dinov2_normalize (x*2-1) and the conv bias are folded into pw / the
        # `add` rows (cls token, positional embedding) built in the wrapper.
        x = jnp.dot(patches_ref[...], pw_ref[...],
                    preferred_element_type=jnp.float32)
        x = x + tok_ref[ADD_OFF:ADD_OFF + S, 0:D]          # tokens [S, D]

        mask = tok_ref[MASK_OFF:MASK_OFF + S, 0:S]          # [S, S] additive

        # DEPTH=2: static unroll is fine; use lax.fori_loop / a depth grid
        # axis at real depth-12 scale to bound vreg live ranges.
        for d in range(DEPTH):
            # -------- MHSA (LN1 + LayerScale folded into qkv/proj weights) --------
            h1 = _norm(x)
            qkv = jnp.dot(h1, qkvw_ref[d],
                          preferred_element_type=jnp.float32)
            qkv = qkv + bias_ref[QKV_B(d):QKV_B(d) + 1, 0:3 * D]

            o = jnp.zeros((S, D), jnp.float32)
            for h in range(NUM_HEADS):
                qh = qkv[:, h * dh:(h + 1) * dh] * scale
                kh = qkv[:, D + h * dh:D + (h + 1) * dh]
                vh = qkv[:, 2 * D + h * dh:2 * D + (h + 1) * dh]
                # Block-diagonal attention over all 2B sequences at once.
                att = jax.lax.dot_general(
                    qh, kh, (((1,), (1,)), ((), ())),
                    preferred_element_type=jnp.float32)      # [S, S]
                att = att + mask
                att = att - jnp.max(att, axis=-1, keepdims=True)
                e = jnp.exp(att)
                p = e / jnp.sum(e, axis=-1, keepdims=True)   # exact softmax
                oh = jnp.dot(p, vh, preferred_element_type=jnp.float32)
                # proj weights pre-split per head in the wrapper:
                # sum_h oh @ Wp[h]  ==  concat(heads) @ Wp  (no concat needed)
                o = o + jnp.dot(oh, projw_ref[d * NUM_HEADS + h],
                                preferred_element_type=jnp.float32)
            x = x + o + bias_ref[PROJ_B(d):PROJ_B(d) + 1, 0:D]

            # -------- MLP (LN2 + LayerScale folded into fc1/fc2 weights) --------
            h2 = _norm(x)
            m = jnp.dot(h2, fc1w_ref[d], preferred_element_type=jnp.float32)
            m = m + bias_ref[FC1_B(d):FC1_B(d) + 1, 0:Dh]
            # TODO(synk): DINOv2 uses exact-erf GELU; tanh-approx GELU used here.
            m = jax.nn.gelu(m, approximate=True)
            m = jnp.dot(m, fc2w_ref[d], preferred_element_type=jnp.float32)
            x = x + m + bias_ref[FC2_B(d):FC2_B(d) + 1, 0:D]

        # ---- final LayerNorm (-> x_norm_patchtokens after masking) ----
        x = (_norm(x) * bias_ref[NORM_W:NORM_W + 1, 0:D]
             + bias_ref[NORM_B:NORM_B + 1, 0:D])

        # ---- MSE(input tokens, target tokens); cls/pad rows masked out.
        # .detach() on the target branch only affects gradients, not this value.
        keep = tok_ref[KEEP_OFF:KEEP_OFF + half, 0:D]
        diff = (x[:half, :] - x[half:, :]) * keep
        loss_ref[0, 0] = jnp.sum(diff * diff) * inv_count

    return kernel


# ----------------------------------------------------------------------------
# Wrapper: crop / patchify / constant folding + packing, then one pallas_call
# ----------------------------------------------------------------------------
def dino_loss(params, inp, tgt):
    # self.loss is an injected callable in the PyTorch module; MSE is used here.
    inp = dinov2_crop(inp)
    tgt = dinov2_crop(tgt)
    assert inp.shape[2] == inp.shape[3]
    assert inp.shape[2] % DINO_PATCH_SIZE == 0

    x = jnp.concatenate([inp, tgt], axis=0)          # both views, one forward
    two_b = x.shape[0]
    batch = two_b // 2

    patches = patchify(x)                            # [2B, Np, K]
    n_patches, K = patches.shape[1], patches.shape[2]
    n_tok = n_patches + 1
    n_pad = ((n_tok + 7) // 8) * 8                   # sublane-pad seq length
    k_pad = ((K + LANE - 1) // LANE) * LANE          # lane-pad contraction dim
    D = EMBED_DIM
    Dh = MLP_RATIO * D
    dh = D // NUM_HEADS
    S = two_b * n_pad
    half = batch * n_pad

    # Per-sequence row layout: [cls slot, patch_0..patch_{Np-1}, pad...]
    # (cls/pad rows are zero -> zero contribution through the matmul).
    patches = jnp.pad(patches, ((0, 0), (1, n_pad - n_tok), (0, k_pad - K)))
    patches = patches.reshape(S, k_pad)

    # Fold dinov2_normalize (x*2-1) into the patch-embed weights:
    #   (2p-1) @ W + b  =  p @ (2W) + (b - 1 @ W)   (zero pad rows => exact)
    pw_eff = 2.0 * jnp.pad(params['patch_w'], ((0, k_pad - K), (0, 0)))
    pb_eff = params['patch_b'] - jnp.sum(params['patch_w'], axis=0, keepdims=True)

    # Per-row additive constant: pos embed + cls token + (folded patch bias on
    # real patch rows only).
    j = jnp.arange(n_pad)
    is_patch = ((j >= 1) & (j < n_tok)).astype(jnp.float32)[:, None]       # [n_pad,1]
    pos_pad = jnp.pad(params['pos_embed'], ((0, n_pad - n_tok), (0, 0)))   # [n_pad,D]
    cls_add = jnp.zeros((n_pad, D), jnp.float32).at[0].set(params['cls_token'][0])
    add = jnp.tile(pos_pad + cls_add + is_patch * pb_eff, (two_b, 1))      # [S, D]

    # Block-diagonal attention bias: token i attends to token j iff same
    # sequence and j is a real token (cls or patch); -1e30 elsewhere.
    row = jnp.arange(S)
    same_seq = (row[:, None] // n_pad) == (row[None, :] // n_pad)
    valid_key = (row[None, :] % n_pad) < n_tok
    attn_mask = jnp.where(same_seq & valid_key, 0.0, -1e30).astype(jnp.float32)

    # MSE keep mask (patch-token rows of the input branch), pre-broadcast to D.
    keep = jnp.tile(jnp.broadcast_to(is_patch, (n_pad, D)), (batch, 1))    # [half,D]

    # Pack the three token-shaped constants into one VMEM input (row-sliced
    # with static, sublane-aligned offsets inside the kernel).
    W = max(D, S)
    tok = jnp.concatenate([
        jnp.pad(add, ((0, 0), (0, W - D))),
        jnp.pad(attn_mask, ((0, 0), (0, W - S))),
        jnp.pad(keep, ((0, 0), (0, W - D))),
    ], axis=0)                                                             # [2S+half, W]

    # ---- fold LN scale/shift and LayerScale into adjacent weights ----
    ln1w_t = jnp.swapaxes(params['ln1_w'], 1, 2)                  # [DEPTH, D, 1]
    qkv_w_eff = ln1w_t * params['qkv_w']                          # row scale
    qkv_b_eff = jnp.matmul(params['ln1_b'], params['qkv_w']) + params['qkv_b']

    gamma1 = params['gamma1']                                     # [DEPTH, 1, D]
    proj_w_eff = params['proj_w'] * gamma1                        # column scale
    proj_b_eff = params['proj_b'] * gamma1
    proj_w_split = proj_w_eff.reshape(DEPTH * NUM_HEADS, dh, D)   # per-head rows

    ln2w_t = jnp.swapaxes(params['ln2_w'], 1, 2)
    fc1_w_eff = ln2w_t * params['fc1_w']
    fc1_b_eff = jnp.matmul(params['ln2_b'], params['fc1_w']) + params['fc1_b']

    gamma2 = params['gamma2']
    fc2_w_eff = params['fc2_w'] * gamma2
    fc2_b_eff = params['fc2_b'] * gamma2

    # ---- pack all [1,*] bias/norm vectors into one block ----
    bias_w = max(3 * D, Dh, D)

    def _row(v):
        v = v.reshape(1, -1)
        return jnp.pad(v, ((0, 0), (0, bias_w - v.shape[1])))

    rows = ([_row(qkv_b_eff[d]) for d in range(DEPTH)]
            + [_row(proj_b_eff[d]) for d in range(DEPTH)]
            + [_row(fc1_b_eff[d]) for d in range(DEPTH)]
            + [_row(fc2_b_eff[d]) for d in range(DEPTH)]
            + [_row(params['norm_w']), _row(params['norm_b'])])
    biases = jnp.concatenate(rows, axis=0)
    pad_rows = (-biases.shape[0]) % 8
    if pad_rows:
        biases = jnp.pad(biases, ((0, pad_rows), (0, 0)))

    kernel = _make_fused_kernel(batch, n_patches, n_pad)
    vmem = pl.BlockSpec(memory_space=pltpu.MemorySpace.VMEM)
    args = (patches, pw_eff, tok, biases,
            qkv_w_eff, proj_w_split, fc1_w_eff, fc2_w_eff)

    loss = pl.pallas_call(
        kernel,
        out_shape=jax.ShapeDtypeStruct((1, 1), jnp.float32),
        in_specs=[vmem] * len(args),
        out_specs=pl.BlockSpec(memory_space=pltpu.MemorySpace.SMEM),
    )(*args)
    return loss[0, 0]


# ----------------------------------------------------------------------------
# Synthetic DINOv2-style parameters
# ----------------------------------------------------------------------------
def init_params(key, in_chans, n_tokens):
    # TODO(synk): pretrained DINOv2 ViT-S/14 weights (torch.hub) cannot be
    # loaded here; deterministic scaled-down stand-in with the same structure.
    P, D, Dh = DINO_PATCH_SIZE, EMBED_DIM, MLP_RATIO * EMBED_DIM
    keys = iter(jax.random.split(key, 16))
    std = 0.02

    def nrm(shape):
        return jax.random.normal(next(keys), shape, jnp.float32) * std

    return {
        'patch_w': nrm((in_chans * P * P, D)),
        'patch_b': jnp.zeros((1, D), jnp.float32),
        'cls_token': nrm((1, D)),
        'pos_embed': nrm((n_tokens, D)),
        'norm_w': jnp.ones((1, D), jnp.float32),
        'norm_b': jnp.zeros((1, D), jnp.float32),
        # per-block params stacked over DEPTH along axis 0
        'ln1_w': jnp.ones((DEPTH, 1, D), jnp.float32),
        'ln1_b': jnp.zeros((DEPTH, 1, D), jnp.float32),
        'qkv_w': nrm((DEPTH, D, 3 * D)),
        'qkv_b': jnp.zeros((DEPTH, 1, 3 * D), jnp.float32),
        'proj_w': nrm((DEPTH, D, D)),
        'proj_b': jnp.zeros((DEPTH, 1, D), jnp.float32),
        'gamma1': jnp.ones((DEPTH, 1, D), jnp.float32),   # LayerScale
        'ln2_w': jnp.ones((DEPTH, 1, D), jnp.float32),
        'ln2_b': jnp.zeros((DEPTH, 1, D), jnp.float32),
        'fc1_w': nrm((DEPTH, D, Dh)),
        'fc1_b': jnp.zeros((DEPTH, 1, Dh), jnp.float32),
        'fc2_w': nrm((DEPTH, Dh, D)),
        'fc2_b': jnp.zeros((DEPTH, 1, D), jnp.float32),
        'gamma2': jnp.ones((DEPTH, 1, D), jnp.float32),   # LayerScale
    }


if __name__ == "__main__":
    key = jax.random.PRNGKey(0)
    k_in, k_tg, k_p = jax.random.split(key, 3)

    # Small shapes: B=2, C=3, 30x30 images -> crop to 28x28 -> 2x2 = 4 patches.
    B, C, H, W = 2, 3, 30, 30
    x_input = jax.random.uniform(k_in, (B, C, H, W), jnp.float32)
    x_target = jax.random.uniform(k_tg, (B, C, H, W), jnp.float32)

    Hc = H - (H % DINO_PATCH_SIZE)
    Wc = W - (W % DINO_PATCH_SIZE)
    n_tokens = (Hc // DINO_PATCH_SIZE) * (Wc // DINO_PATCH_SIZE) + 1
    params = init_params(k_p, C, n_tokens)

    loss_fn = jax.jit(functools.partial(dino_loss, params))
    loss = loss_fn(x_input, x_target)
    jax.block_until_ready(loss)
    assert loss.shape == () and jnp.isfinite(loss)
    print("KERNEL_OK")
</pallas_src>

<mosaic_0001>
module attributes {stable_mosaic.version = 11 : i64} {
  func.func @kernel(%arg0: memref<32x640xf32, #tpu.memory_space<vmem>>, %arg1: memref<640x32xf32, #tpu.memory_space<vmem>>, %arg2: memref<80x32xf32, #tpu.memory_space<vmem>>, %arg3: memref<16x128xf32, #tpu.memory_space<vmem>>, %arg4: memref<2x32x96xf32, #tpu.memory_space<vmem>>, %arg5: memref<4x16x32xf32, #tpu.memory_space<vmem>>, %arg6: memref<2x32x128xf32, #tpu.memory_space<vmem>>, %arg7: memref<2x128x32xf32, #tpu.memory_space<vmem>>, %arg8: memref<1x1xf32, #tpu.memory_space<smem>>) attributes {dimension_semantics = [], scalar_prefetch = 0 : i64, scratch_operands = 0 : i64, tpu.core_type = #tpu.core_type<tc>} {
    %c0 = arith.constant 0 : index
    %c0_0 = arith.constant 0 : index
    %0 = vector.load %arg0[%c0, %c0_0] : memref<32x640xf32, #tpu.memory_space<vmem>>, vector<32x640xf32>
    %c0_1 = arith.constant 0 : index
    %c0_2 = arith.constant 0 : index
    %1 = vector.load %arg1[%c0_1, %c0_2] : memref<640x32xf32, #tpu.memory_space<vmem>>, vector<640x32xf32>
    %cst = arith.constant dense<0.000000e+00> : vector<32x32xf32>
    %2 = tpu.matmul %0, %1, %cst {dimension_numbers = #tpu.dot_dimension_numbers<[1], [0], [0], [1], [0, 0, 1, 1], [], []>} : vector<32x640xf32>, vector<640x32xf32>, vector<32x32xf32> -> vector<32x32xf32>
    %c0_3 = arith.constant 0 : index
    %c0_4 = arith.constant 0 : index
    %3 = vector.load %arg2[%c0_3, %c0_4] : memref<80x32xf32, #tpu.memory_space<vmem>>, vector<32x32xf32>
    %4 = arith.addf %2, %3 : vector<32x32xf32>
    %c32 = arith.constant 32 : index
    %c0_5 = arith.constant 0 : index
    %5 = vector.load %arg2[%c32, %c0_5] : memref<80x32xf32, #tpu.memory_space<vmem>>, vector<32x32xf32>
    %cst_6 = arith.constant dense<0.000000e+00> : vector<32xf32>
    %6 = vector.multi_reduction <add>, %4, %cst_6 [1] : vector<32x32xf32> to vector<32xf32>
    %7 = vector.shape_cast %6 : vector<32xf32> to vector<32x1xf32>
    %cst_7 = arith.constant 3.200000e+01 : f32
    %8 = vector.broadcast %cst_7 : f32 to vector<32x1xf32>
    %9 = arith.divf %7, %8 : vector<32x1xf32>
    %10 = vector.broadcast %9 : vector<32x1xf32> to vector<32x32xf32>
    %11 = arith.subf %4, %10 : vector<32x32xf32>
    %12 = arith.mulf %11, %11 : vector<32x32xf32>
    %cst_8 = arith.constant dense<0.000000e+00> : vector<32xf32>
    %13 = vector.multi_reduction <add>, %12, %cst_8 [1] : vector<32x32xf32> to vector<32xf32>
    %14 = vector.shape_cast %13 : vector<32xf32> to vector<32x1xf32>
    %cst_9 = arith.constant 3.200000e+01 : f32
    %15 = vector.broadcast %cst_9 : f32 to vector<32x1xf32>
    %16 = arith.divf %14, %15 : vector<32x1xf32>
    %17 = vector.broadcast %9 : vector<32x1xf32> to vector<32x32xf32>
    %18 = arith.subf %4, %17 : vector<32x32xf32>
    %cst_10 = arith.constant 9.99999997E-7 : f32
    %19 = vector.broadcast %cst_10 : f32 to vector<32x1xf32>
    %20 = arith.addf %16, %19 : vector<32x1xf32>
    %21 = math.rsqrt %20 : vector<32x1xf32>
    %22 = vector.broadcast %21 : vector<32x1xf32> to vector<32x32xf32>
    %23 = arith.mulf %18, %22 : vector<32x32xf32>
    %c0_11 = arith.constant 0 : index
    %c0_12 = arith.constant 0 : index
    %c0_13 = arith.constant 0 : index
    %24 = vector.load %arg4[%c0_11, %c0_12, %c0_13] : memref<2x32x96xf32, #tpu.memory_space<vmem>>, vector<1x32x96xf32>
    %25 = vector.shape_cast %24 : vector<1x32x96xf32> to vector<32x96xf32>
    %cst_14 = arith.constant dense<0.000000e+00> : vector<32x96xf32>
    %26 = tpu.matmul %23, %25, %cst_14 {dimension_numbers = #tpu.dot_dimension_numbers<[1], [0], [0], [1], [0, 0, 1, 1], [], []>} : vector<32x32xf32>, vector<32x96xf32>, vector<32x96xf32> -> vector<32x96xf32>
    %c0_15 = arith.constant 0 : index
    %c0_16 = arith.constant 0 : index
    %27 = vector.load %arg3[%c0_15, %c0_16] : memref<16x128xf32, #tpu.memory_space<vmem>>, vector<1x96xf32>
    %28 = vector.broadcast %27 : vector<1x96xf32> to vector<32x96xf32>
    %29 = arith.addf %26, %28 : vector<32x96xf32>
    %cst_17 = arith.constant 0.000000e+00 : f32
    %30 = vector.broadcast %cst_17 : f32 to vector<32x32xf32>
    %31 = vector.extract_strided_slice %29 {offsets = [0, 0], sizes = [32, 16], strides = [1, 1]} : vector<32x96xf32> to vector<32x16xf32>
    %cst_18 = arith.constant 2.500000e-01 : f32
    %32 = vector.broadcast %cst_18 : f32 to vector<32x16xf32>
    %33 = arith.mulf %31, %32 : vector<32x16xf32>
    %34 = vector.extract_strided_slice %29 {offsets = [0, 32], sizes = [32, 16], strides = [1, 1]} : vector<32x96xf32> to vector<32x16xf32>
    %35 = vector.extract_strided_slice %29 {offsets = [0, 64], sizes = [32, 16], strides = [1, 1]} : vector<32x96xf32> to vector<32x16xf32>
    %cst_19 = arith.constant dense<0.000000e+00> : vector<32x32xf32>
    %36 = tpu.matmul %33, %34, %cst_19 {dimension_numbers = #tpu.dot_dimension_numbers<[1], [1], [0], [0], [0, 0, 1, 0], [], []>} : vector<32x16xf32>, vector<32x16xf32>, vector<32x32xf32> -> vector<32x32xf32>
    %37 = arith.addf %36, %5 : vector<32x32xf32>
    %cst_20 = arith.constant dense<0xFF800000> : vector<32xf32>
    %38 = vector.multi_reduction <maximumf>, %37, %cst_20 [1] : vector<32x32xf32> to vector<32xf32>
    %39 = vector.shape_cast %38 : vector<32xf32> to vector<32x1xf32>
    %40 = vector.broadcast %39 : vector<32x1xf32> to vector<32x32xf32>
    %41 = arith.subf %37, %40 : vector<32x32xf32>
    %42 = math.exp %41 : vector<32x32xf32>
    %cst_21 = arith.constant dense<0.000000e+00> : vector<32xf32>
    %43 = vector.multi_reduction <add>, %42, %cst_21 [1] : vector<32x32xf32> to vector<32xf32>
    %44 = vector.shape_cast %43 : vector<32xf32> to vector<32x1xf32>
    %45 = vector.broadcast %44 : vector<32x1xf32> to vector<32x32xf32>
    %46 = arith.divf %42, %45 : vector<32x32xf32>
    %cst_22 = arith.constant dense<0.000000e+00> : vector<32x16xf32>
    %47 = tpu.matmul %46, %35, %cst_22 {dimension_numbers = #tpu.dot_dimension_numbers<[1], [0], [0], [1], [0, 0, 1, 1], [], []>} : vector<32x32xf32>, vector<32x16xf32>, vector<32x16xf32> -> vector<32x16xf32>
    %c0_23 = arith.constant 0 : index
    %c0_24 = arith.constant 0 : index
    %c0_25 = arith.constant 0 : index
    %48 = vector.load %arg5[%c0_23, %c0_24, %c0_25] : memref<4x16x32xf32, #tpu.memory_space<vmem>>, vector<1x16x32xf32>
    %49 = vector.shape_cast %48 : vector<1x16x32xf32> to vector<16x32xf32>
    %cst_26 = arith.constant dense<0.000000e+00> : vector<32x32xf32>
    %50 = tpu.matmul %47, %49, %cst_26 {dimension_numbers = #tpu.dot_dimension_numbers<[1], [0], [0], [1], [0, 0, 1, 1], [], []>} : vector<32x16xf32>, vector<16x32xf32>, vector<32x32xf32> -> vector<32x32xf32>
    %51 = arith.addf %30, %50 : vector<32x32xf32>
    %52 = vector.extract_strided_slice %29 {offsets = [0, 16], sizes = [32, 16], strides = [1, 1]} : vector<32x96xf32> to vector<32x16xf32>
    %cst_27 = arith.constant 2.500000e-01 : f32
    %53 = vector.broadcast %cst_27 : f32 to vector<32x16xf32>
    %54 = arith.mulf %52, %53 : vector<32x16xf32>
    %55 = vector.extract_strided_slice %29 {offsets = [0, 48], sizes = [32, 16], strides = [1, 1]} : vector<32x96xf32> to vector<32x16xf32>
    %56 = vector.extract_strided_slice %29 {offsets = [0, 80], sizes = [32, 16], strides = [1, 1]} : vector<32x96xf32> to vector<32x16xf32>
    %cst_28 = arith.constant dense<0.000000e+00> : vector<32x32xf32>
    %57 = tpu.matmul %54, %55, %cst_28 {dimension_numbers = #tpu.dot_dimension_numbers<[1], [1], [0], [0], [0, 0, 1, 0], [], []>} : vector<32x16xf32>, vector<32x16xf32>, vector<32x32xf32> -> vector<32x32xf32>
    %58 = arith.addf %57, %5 : vector<32x32xf32>
    %cst_29 = arith.constant dense<0xFF800000> : vector<32xf32>
    %59 = vector.multi_reduction <maximumf>, %58, %cst_29 [1] : vector<32x32xf32> to vector<32xf32>
    %60 = vector.shape_cast %59 : vector<32xf32> to vector<32x1xf32>
    %61 = vector.broadcast %60 : vector<32x1xf32> to vector<32x32xf32>
    %62 = arith.subf %58, %61 : vector<32x32xf32>
    %63 = math.exp %62 : vector<32x32xf32>
    %cst_30 = arith.constant dense<0.000000e+00> : vector<32xf32>
    %64 = vector.multi_reduction <add>, %63, %cst_30 [1] : vector<32x32xf32> to vector<32xf32>
    %65 = vector.shape_cast %64 : vector<32xf32> to vector<32x1xf32>
    %66 = vector.broadcast %65 : vector<32x1xf32> to vector<32x32xf32>
    %67 = arith.divf %63, %66 : vector<32x32xf32>
    %cst_31 = arith.constant dense<0.000000e+00> : vector<32x16xf32>
    %68 = tpu.matmul %67, %56, %cst_31 {dimension_numbers = #tpu.dot_dimension_numbers<[1], [0], [0], [1], [0, 0, 1, 1], [], []>} : vector<32x32xf32>, vector<32x16xf32>, vector<32x16xf32> -> vector<32x16xf32>
    %c1 = arith.constant 1 : index
    %c0_32 = arith.constant 0 : index
    %c0_33 = arith.constant 0 : index
    %69 = vector.load %arg5[%c1, %c0_32, %c0_33] : memref<4x16x32xf32, #tpu.memory_space<vmem>>, vector<1x16x32xf32>
    %70 = vector.shape_cast %69 : vector<1x16x32xf32> to vector<16x32xf32>
    %cst_34 = arith.constant dense<0.000000e+00> : vector<32x32xf32>
    %71 = tpu.matmul %68, %70, %cst_34 {dimension_numbers = #tpu.dot_dimension_numbers<[1], [0], [0], [1], [0, 0, 1, 1], [], []>} : vector<32x16xf32>, vector<16x32xf32>, vector<32x32xf32> -> vector<32x32xf32>
    %72 = arith.addf %51, %71 : vector<32x32xf32>
    %73 = arith.addf %4, %72 : vector<32x32xf32>
    %c2 = arith.constant 2 : index
    %c0_35 = arith.constant 0 : index
    %74 = vector.load %arg3[%c2, %c0_35] : memref<16x128xf32, #tpu.memory_space<vmem>>, vector<1x32xf32>
    %75 = vector.broadcast %74 : vector<1x32xf32> to vector<32x32xf32>
    %76 = arith.addf %73, %75 : vector<32x32xf32>
    %cst_36 = arith.constant dense<0.000000e+00> : vector<32xf32>
    %77 = vector.multi_reduction <add>, %76, %cst_36 [1] : vector<32x32xf32> to vector<32xf32>
    %78 = vector.shape_cast %77 : vector<32xf32> to vector<32x1xf32>
    %cst_37 = arith.constant 3.200000e+01 : f32
    %79 = vector.broadcast %cst_37 : f32 to vector<32x1xf32>
    %80 = arith.divf %78, %79 : vector<32x1xf32>
    %81 = vector.broadcast %80 : vector<32x1xf32> to vector<32x32xf32>
    %82 = arith.subf %76, %81 : vector<32x32xf32>
    %83 = arith.mulf %82, %82 : vector<32x32xf32>
    %cst_38 = arith.constant dense<0.000000e+00> : vector<32xf32>
    %84 = vector.multi_reduction <add>, %83, %cst_38 [1] : vector<32x32xf32> to vector<32xf32>
    %85 = vector.shape_cast %84 : vector<32xf32> to vector<32x1xf32>
    %cst_39 = arith.constant 3.200000e+01 : f32
    %86 = vector.broadcast %cst_39 : f32 to vector<32x1xf32>
    %87 = arith.divf %85, %86 : vector<32x1xf32>
    %88 = vector.broadcast %80 : vector<32x1xf32> to vector<32x32xf32>
    %89 = arith.subf %76, %88 : vector<32x32xf32>
    %cst_40 = arith.constant 9.99999997E-7 : f32
    %90 = vector.broadcast %cst_40 : f32 to vector<32x1xf32>
    %91 = arith.addf %87, %90 : vector<32x1xf32>
    %92 = math.rsqrt %91 : vector<32x1xf32>
    %93 = vector.broadcast %92 : vector<32x1xf32> to vector<32x32xf32>
    %94 = arith.mulf %89, %93 : vector<32x32xf32>
    %c0_41 = arith.constant 0 : index
    %c0_42 = arith.constant 0 : index
    %c0_43 = arith.constant 0 : index
    %95 = vector.load %arg6[%c0_41, %c0_42, %c0_43] : memref<2x32x128xf32, #tpu.memory_space<vmem>>, vector<1x32x128xf32>
    %96 = vector.shape_cast %95 : vector<1x32x128xf32> to vector<32x128xf32>
    %cst_44 = arith.constant dense<0.000000e+00> : vector<32x128xf32>
    %97 = tpu.matmul %94, %96, %cst_44 {dimension_numbers = #tpu.dot_dimension_numbers<[1], [0], [0], [1], [0, 0, 1, 1], [], []>} : vector<32x32xf32>, vector<32x128xf32>, vector<32x128xf32> -> vector<32x128xf32>
    %c4 = arith.constant 4 : index
    %c0_45 = arith.constant 0 : index
    %98 = vector.load %arg3[%c4, %c0_45] : memref<16x128xf32, #tpu.memory_space<vmem>>, vector<1x128xf32>
    %99 = vector.broadcast %98 : vector<1x128xf32> to vector<32x128xf32>
    %100 = arith.addf %97, %99 : vector<32x128xf32>
    %101 = arith.mulf %100, %100 : vector<32x128xf32>
    %102 = arith.mulf %100, %101 : vector<32x128xf32>
    %cst_46 = arith.constant 4.471500e-02 : f32
    %103 = vector.broadcast %cst_46 : f32 to vector<32x128xf32>
    %104 = arith.mulf %103, %102 : vector<32x128xf32>
    %105 = arith.addf %100, %104 : vector<32x128xf32>
    %cst_47 = arith.constant 0.797884583 : f32
    %106 = vector.broadcast %cst_47 : f32 to vector<32x128xf32>
    %107 = arith.mulf %106, %105 : vector<32x128xf32>
    %108 = math.tanh %107 : vector<32x128xf32>
    %cst_48 = arith.constant 1.000000e+00 : f32
    %109 = vector.broadcast %cst_48 : f32 to vector<32x128xf32>
    %110 = arith.addf %109, %108 : vector<32x128xf32>
    %cst_49 = arith.constant 5.000000e-01 : f32
    %111 = vector.broadcast %cst_49 : f32 to vector<32x128xf32>
    %112 = arith.mulf %111, %110 : vector<32x128xf32>
    %113 = arith.mulf %100, %112 : vector<32x128xf32>
    %c0_50 = arith.constant 0 : index
    %c0_51 = arith.constant 0 : index
    %c0_52 = arith.constant 0 : index
    %114 = vector.load %arg7[%c0_50, %c0_51, %c0_52] : memref<2x128x32xf32, #tpu.memory_space<vmem>>, vector<1x128x32xf32>
    %115 = vector.shape_cast %114 : vector<1x128x32xf32> to vector<128x32xf32>
    %cst_53 = arith.constant dense<0.000000e+00> : vector<32x32xf32>
    %116 = tpu.matmul %113, %115, %cst_53 {dimension_numbers = #tpu.dot_dimension_numbers<[1], [0], [0], [1], [0, 0, 1, 1], [], []>} : vector<32x128xf32>, vector<128x32xf32>, vector<32x32xf32> -> vector<32x32xf32>
    %117 = arith.addf %76, %116 : vector<32x32xf32>
    %c6 = arith.constant 6 : index
    %c0_54 = arith.constant 0 : index
    %118 = vector.load %arg3[%c6, %c0_54] : memref<16x128xf32, #tpu.memory_space<vmem>>, vector<1x32xf32>
    %119 = vector.broadcast %118 : vector<1x32xf32> to vector<32x32xf32>
    %120 = arith.addf %117, %119 : vector<32x32xf32>
    %cst_55 = arith.constant dense<0.000000e+00> : vector<32xf32>
    %121 = vector.multi_reduction <add>, %120, %cst_55 [1] : vector<32x32xf32> to vector<32xf32>
    %122 = vector.shape_cast %121 : vector<32xf32> to vector<32x1xf32>
    %cst_56 = arith.constant 3.200000e+01 : f32
    %123 = vector.broadcast %cst_56 : f32 to vector<32x1xf32>
    %124 = arith.divf %122, %123 : vector<32x1xf32>
    %125 = vector.broadcast %124 : vector<32x1xf32> to vector<32x32xf32>
    %126 = arith.subf %120, %125 : vector<32x32xf32>
    %127 = arith.mulf %126, %126 : vector<32x32xf32>
    %cst_57 = arith.constant dense<0.000000e+00> : vector<32xf32>
    %128 = vector.multi_reduction <add>, %127, %cst_57 [1] : vector<32x32xf32> to vector<32xf32>
    %129 = vector.shape_cast %128 : vector<32xf32> to vector<32x1xf32>
    %cst_58 = arith.constant 3.200000e+01 : f32
    %130 = vector.broadcast %cst_58 : f32 to vector<32x1xf32>
    %131 = arith.divf %129, %130 : vector<32x1xf32>
    %132 = vector.broadcast %124 : vector<32x1xf32> to vector<32x32xf32>
    %133 = arith.subf %120, %132 : vector<32x32xf32>
    %cst_59 = arith.constant 9.99999997E-7 : f32
    %134 = vector.broadcast %cst_59 : f32 to vector<32x1xf32>
    %135 = arith.addf %131, %134 : vector<32x1xf32>
    %136 = math.rsqrt %135 : vector<32x1xf32>
    %137 = vector.broadcast %136 : vector<32x1xf32> to vector<32x32xf32>
    %138 = arith.mulf %133, %137 : vector<32x32xf32>
    %c1_60 = arith.constant 1 : index
    %c0_61 = arith.constant 0 : index
    %c0_62 = arith.constant 0 : index
    %139 = vector.load %arg4[%c1_60, %c0_61, %c0_62] : memref<2x32x96xf32, #tpu.memory_space<vmem>>, vector<1x32x96xf32>
    %140 = vector.shape_cast %139 : vector<1x32x96xf32> to vector<32x96xf32>
    %cst_63 = arith.constant dense<0.000000e+00> : vector<32x96xf32>
    %141 = tpu.matmul %138, %140, %cst_63 {dimension_numbers = #tpu.dot_dimension_numbers<[1], [0], [0], [1], [0, 0, 1, 1], [], []>} : vector<32x32xf32>, vector<32x96xf32>, vector<32x96xf32> -> vector<32x96xf32>
    %c1_64 = arith.constant 1 : index
    %c0_65 = arith.constant 0 : index
    %142 = vector.load %arg3[%c1_64, %c0_65] : memref<16x128xf32, #tpu.memory_space<vmem>>, vector<1x96xf32>
    %143 = vector.broadcast %142 : vector<1x96xf32> to vector<32x96xf32>
    %144 = arith.addf %141, %143 : vector<32x96xf32>
    %cst_66 = arith.constant 0.000000e+00 : f32
    %145 = vector.broadcast %cst_66 : f32 to vector<32x32xf32>
    %146 = vector.extract_strided_slice %144 {offsets = [0, 0], sizes = [32, 16], strides = [1, 1]} : vector<32x96xf32> to vector<32x16xf32>
    %cst_67 = arith.constant 2.500000e-01 : f32
    %147 = vector.broadcast %cst_67 : f32 to vector<32x16xf32>
    %148 = arith.mulf %146, %147 : vector<32x16xf32>
    %149 = vector.extract_strided_slice %144 {offsets = [0, 32], sizes = [32, 16], strides = [1, 1]} : vector<32x96xf32> to vector<32x16xf32>
    %150 = vector.extract_strided_slice %144 {offsets = [0, 64], sizes = [32, 16], strides = [1, 1]} : vector<32x96xf32> to vector<32x16xf32>
    %cst_68 = arith.constant dense<0.000000e+00> : vector<32x32xf32>
    %151 = tpu.matmul %148, %149, %cst_68 {dimension_numbers = #tpu.dot_dimension_numbers<[1], [1], [0], [0], [0, 0, 1, 0], [], []>} : vector<32x16xf32>, vector<32x16xf32>, vector<32x32xf32> -> vector<32x32xf32>
    %152 = arith.addf %151, %5 : vector<32x32xf32>
    %cst_69 = arith.constant dense<0xFF800000> : vector<32xf32>
    %153 = vector.multi_reduction <maximumf>, %152, %cst_69 [1] : vector<32x32xf32> to vector<32xf32>
    %154 = vector.shape_cast %153 : vector<32xf32> to vector<32x1xf32>
    %155 = vector.broadcast %154 : vector<32x1xf32> to vector<32x32xf32>
    %156 = arith.subf %152, %155 : vector<32x32xf32>
    %157 = math.exp %156 : vector<32x32xf32>
    %cst_70 = arith.constant dense<0.000000e+00> : vector<32xf32>
    %158 = vector.multi_reduction <add>, %157, %cst_70 [1] : vector<32x32xf32> to vector<32xf32>
    %159 = vector.shape_cast %158 : vector<32xf32> to vector<32x1xf32>
    %160 = vector.broadcast %159 : vector<32x1xf32> to vector<32x32xf32>
    %161 = arith.divf %157, %160 : vector<32x32xf32>
    %cst_71 = arith.constant dense<0.000000e+00> : vector<32x16xf32>
    %162 = tpu.matmul %161, %150, %cst_71 {dimension_numbers = #tpu.dot_dimension_numbers<[1], [0], [0], [1], [0, 0, 1, 1], [], []>} : vector<32x32xf32>, vector<32x16xf32>, vector<32x16xf32> -> vector<32x16xf32>
    %c2_72 = arith.constant 2 : index
    %c0_73 = arith.constant 0 : index
    %c0_74 = arith.constant 0 : index
    %163 = vector.load %arg5[%c2_72, %c0_73, %c0_74] : memref<4x16x32xf32, #tpu.memory_space<vmem>>, vector<1x16x32xf32>
    %164 = vector.shape_cast %163 : vector<1x16x32xf32> to vector<16x32xf32>
    %cst_75 = arith.constant dense<0.000000e+00> : vector<32x32xf32>
    %165 = tpu.matmul %162, %164, %cst_75 {dimension_numbers = #tpu.dot_dimension_numbers<[1], [0], [0], [1], [0, 0, 1, 1], [], []>} : vector<32x16xf32>, vector<16x32xf32>, vector<32x32xf32> -> vector<32x32xf32>
    %166 = arith.addf %145, %165 : vector<32x32xf32>
    %167 = vector.extract_strided_slice %144 {offsets = [0, 16], sizes = [32, 16], strides = [1, 1]} : vector<32x96xf32> to vector<32x16xf32>
    %cst_76 = arith.constant 2.500000e-01 : f32
    %168 = vector.broadcast %cst_76 : f32 to vector<32x16xf32>
    %169 = arith.mulf %167, %168 : vector<32x16xf32>
    %170 = vector.extract_strided_slice %144 {offsets = [0, 48], sizes = [32, 16], strides = [1, 1]} : vector<32x96xf32> to vector<32x16xf32>
    %171 = vector.extract_strided_slice %144 {offsets = [0, 80], sizes = [32, 16], strides = [1, 1]} : vector<32x96xf32> to vector<32x16xf32>
    %cst_77 = arith.constant dense<0.000000e+00> : vector<32x32xf32>
    %172 = tpu.matmul %169, %170, %cst_77 {dimension_numbers = #tpu.dot_dimension_numbers<[1], [1], [0], [0], [0, 0, 1, 0], [], []>} : vector<32x16xf32>, vector<32x16xf32>, vector<32x32xf32> -> vector<32x32xf32>
    %173 = arith.addf %172, %5 : vector<32x32xf32>
    %cst_78 = arith.constant dense<0xFF800000> : vector<32xf32>
    %174 = vector.multi_reduction <maximumf>, %173, %cst_78 [1] : vector<32x32xf32> to vector<32xf32>
    %175 = vector.shape_cast %174 : vector<32xf32> to vector<32x1xf32>
    %176 = vector.broadcast %175 : vector<32x1xf32> to vector<32x32xf32>
    %177 = arith.subf %173, %176 : vector<32x32xf32>
    %178 = math.exp %177 : vector<32x32xf32>
    %cst_79 = arith.constant dense<0.000000e+00> : vector<32xf32>
    %179 = vector.multi_reduction <add>, %178, %cst_79 [1] : vector<32x32xf32> to vector<32xf32>
    %180 = vector.shape_cast %179 : vector<32xf32> to vector<32x1xf32>
    %181 = vector.broadcast %180 : vector<32x1xf32> to vector<32x32xf32>
    %182 = arith.divf %178, %181 : vector<32x32xf32>
    %cst_80 = arith.constant dense<0.000000e+00> : vector<32x16xf32>
    %183 = tpu.matmul %182, %171, %cst_80 {dimension_numbers = #tpu.dot_dimension_numbers<[1], [0], [0], [1], [0, 0, 1, 1], [], []>} : vector<32x32xf32>, vector<32x16xf32>, vector<32x16xf32> -> vector<32x16xf32>
    %c3 = arith.constant 3 : index
    %c0_81 = arith.constant 0 : index
    %c0_82 = arith.constant 0 : index
    %184 = vector.load %arg5[%c3, %c0_81, %c0_82] : memref<4x16x32xf32, #tpu.memory_space<vmem>>, vector<1x16x32xf32>
    %185 = vector.shape_cast %184 : vector<1x16x32xf32> to vector<16x32xf32>
    %cst_83 = arith.constant dense<0.000000e+00> : vector<32x32xf32>
    %186 = tpu.matmul %183, %185, %cst_83 {dimension_numbers = #tpu.dot_dimension_numbers<[1], [0], [0], [1], [0, 0, 1, 1], [], []>} : vector<32x16xf32>, vector<16x32xf32>, vector<32x32xf32> -> vector<32x32xf32>
    %187 = arith.addf %166, %186 : vector<32x32xf32>
    %188 = arith.addf %120, %187 : vector<32x32xf32>
    %c3_84 = arith.constant 3 : index
    %c0_85 = arith.constant 0 : index
    %189 = vector.load %arg3[%c3_84, %c0_85] : memref<16x128xf32, #tpu.memory_space<vmem>>, vector<1x32xf32>
    %190 = vector.broadcast %189 : vector<1x32xf32> to vector<32x32xf32>
    %191 = arith.addf %188, %190 : vector<32x32xf32>
    %cst_86 = arith.constant dense<0.000000e+00> : vector<32xf32>
    %192 = vector.multi_reduction <add>, %191, %cst_86 [1] : vector<32x32xf32> to vector<32xf32>
    %193 = vector.shape_cast %192 : vector<32xf32> to vector<32x1xf32>
    %cst_87 = arith.constant 3.200000e+01 : f32
    %194 = vector.broadcast %cst_87 : f32 to vector<32x1xf32>
    %195 = arith.divf %193, %194 : vector<32x1xf32>
    %196 = vector.broadcast %195 : vector<32x1xf32> to vector<32x32xf32>
    %197 = arith.subf %191, %196 : vector<32x32xf32>
    %198 = arith.mulf %197, %197 : vector<32x32xf32>
    %cst_88 = arith.constant dense<0.000000e+00> : vector<32xf32>
    %199 = vector.multi_reduction <add>, %198, %cst_88 [1] : vector<32x32xf32> to vector<32xf32>
    %200 = vector.shape_cast %199 : vector<32xf32> to vector<32x1xf32>
    %cst_89 = arith.constant 3.200000e+01 : f32
    %201 = vector.broadcast %cst_89 : f32 to vector<32x1xf32>
    %202 = arith.divf %200, %201 : vector<32x1xf32>
    %203 = vector.broadcast %195 : vector<32x1xf32> to vector<32x32xf32>
    %204 = arith.subf %191, %203 : vector<32x32xf32>
    %cst_90 = arith.constant 9.99999997E-7 : f32
    %205 = vector.broadcast %cst_90 : f32 to vector<32x1xf32>
    %206 = arith.addf %202, %205 : vector<32x1xf32>
    %207 = math.rsqrt %206 : vector<32x1xf32>
    %208 = vector.broadcast %207 : vector<32x1xf32> to vector<32x32xf32>
    %209 = arith.mulf %204, %208 : vector<32x32xf32>
    %c1_91 = arith.constant 1 : index
    %c0_92 = arith.constant 0 : index
    %c0_93 = arith.constant 0 : index
    %210 = vector.load %arg6[%c1_91, %c0_92, %c0_93] : memref<2x32x128xf32, #tpu.memory_space<vmem>>, vector<1x32x128xf32>
    %211 = vector.shape_cast %210 : vector<1x32x128xf32> to vector<32x128xf32>
    %cst_94 = arith.constant dense<0.000000e+00> : vector<32x128xf32>
    %212 = tpu.matmul %209, %211, %cst_94 {dimension_numbers = #tpu.dot_dimension_numbers<[1], [0], [0], [1], [0, 0, 1, 1], [], []>} : vector<32x32xf32>, vector<32x128xf32>, vector<32x128xf32> -> vector<32x128xf32>
    %c5 = arith.constant 5 : index
    %c0_95 = arith.constant 0 : index
    %213 = vector.load %arg3[%c5, %c0_95] : memref<16x128xf32, #tpu.memory_space<vmem>>, vector<1x128xf32>
    %214 = vector.broadcast %213 : vector<1x128xf32> to vector<32x128xf32>
    %215 = arith.addf %212, %214 : vector<32x128xf32>
    %216 = arith.mulf %215, %215 : vector<32x128xf32>
    %217 = arith.mulf %215, %216 : vector<32x128xf32>
    %cst_96 = arith.constant 4.471500e-02 : f32
    %218 = vector.broadcast %cst_96 : f32 to vector<32x128xf32>
    %219 = arith.mulf %218, %217 : vector<32x128xf32>
    %220 = arith.addf %215, %219 : vector<32x128xf32>
    %cst_97 = arith.constant 0.797884583 : f32
    %221 = vector.broadcast %cst_97 : f32 to vector<32x128xf32>
    %222 = arith.mulf %221, %220 : vector<32x128xf32>
    %223 = math.tanh %222 : vector<32x128xf32>
    %cst_98 = arith.constant 1.000000e+00 : f32
    %224 = vector.broadcast %cst_98 : f32 to vector<32x128xf32>
    %225 = arith.addf %224, %223 : vector<32x128xf32>
    %cst_99 = arith.constant 5.000000e-01 : f32
    %226 = vector.broadcast %cst_99 : f32 to vector<32x128xf32>
    %227 = arith.mulf %226, %225 : vector<32x128xf32>
    %228 = arith.mulf %215, %227 : vector<32x128xf32>
    %c1_100 = arith.constant 1 : index
    %c0_101 = arith.constant 0 : index
    %c0_102 = arith.constant 0 : index
    %229 = vector.load %arg7[%c1_100, %c0_101, %c0_102] : memref<2x128x32xf32, #tpu.memory_space<vmem>>, vector<1x128x32xf32>
    %230 = vector.shape_cast %229 : vector<1x128x32xf32> to vector<128x32xf32>
    %cst_103 = arith.constant dense<0.000000e+00> : vector<32x32xf32>
    %231 = tpu.matmul %228, %230, %cst_103 {dimension_numbers = #tpu.dot_dimension_numbers<[1], [0], [0], [1], [0, 0, 1, 1], [], []>} : vector<32x128xf32>, vector<128x32xf32>, vector<32x32xf32> -> vector<32x32xf32>
    %232 = arith.addf %191, %231 : vector<32x32xf32>
    %c7 = arith.constant 7 : index
    %c0_104 = arith.constant 0 : index
    %233 = vector.load %arg3[%c7, %c0_104] : memref<16x128xf32, #tpu.memory_space<vmem>>, vector<1x32xf32>
    %234 = vector.broadcast %233 : vector<1x32xf32> to vector<32x32xf32>
    %235 = arith.addf %232, %234 : vector<32x32xf32>
    %cst_105 = arith.constant dense<0.000000e+00> : vector<32xf32>
    %236 = vector.multi_reduction <add>, %235, %cst_105 [1] : vector<32x32xf32> to vector<32xf32>
    %237 = vector.shape_cast %236 : vector<32xf32> to vector<32x1xf32>
    %cst_106 = arith.constant 3.200000e+01 : f32
    %238 = vector.broadcast %cst_106 : f32 to vector<32x1xf32>
    %239 = arith.divf %237, %238 : vector<32x1xf32>
    %240 = vector.broadcast %239 : vector<32x1xf32> to vector<32x32xf32>
    %241 = arith.subf %235, %240 : vector<32x32xf32>
    %242 = arith.mulf %241, %241 : vector<32x32xf32>
    %cst_107 = arith.constant dense<0.000000e+00> : vector<32xf32>
    %243 = vector.multi_reduction <add>, %242, %cst_107 [1] : vector<32x32xf32> to vector<32xf32>
    %244 = vector.shape_cast %243 : vector<32xf32> to vector<32x1xf32>
    %cst_108 = arith.constant 3.200000e+01 : f32
    %245 = vector.broadcast %cst_108 : f32 to vector<32x1xf32>
    %246 = arith.divf %244, %245 : vector<32x1xf32>
    %247 = vector.broadcast %239 : vector<32x1xf32> to vector<32x32xf32>
    %248 = arith.subf %235, %247 : vector<32x32xf32>
    %cst_109 = arith.constant 9.99999997E-7 : f32
    %249 = vector.broadcast %cst_109 : f32 to vector<32x1xf32>
    %250 = arith.addf %246, %249 : vector<32x1xf32>
    %251 = math.rsqrt %250 : vector<32x1xf32>
    %252 = vector.broadcast %251 : vector<32x1xf32> to vector<32x32xf32>
    %253 = arith.mulf %248, %252 : vector<32x32xf32>
    %c8 = arith.constant 8 : index
    %c0_110 = arith.constant 0 : index
    %254 = vector.load %arg3[%c8, %c0_110] : memref<16x128xf32, #tpu.memory_space<vmem>>, vector<1x32xf32>
    %255 = vector.broadcast %254 : vector<1x32xf32> to vector<32x32xf32>
    %256 = arith.mulf %253, %255 : vector<32x32xf32>
    %c9 = arith.constant 9 : index
    %c0_111 = arith.constant 0 : index
    %257 = vector.load %arg3[%c9, %c0_111] : memref<16x128xf32, #tpu.memory_space<vmem>>, vector<1x32xf32>
    %258 = vector.broadcast %257 : vector<1x32xf32> to vector<32x32xf32>
    %259 = arith.addf %256, %258 : vector<32x32xf32>
    %c64 = arith.constant 64 : index
    %c0_112 = arith.constant 0 : index
    %260 = vector.load %arg2[%c64, %c0_112] : memref<80x32xf32, #tpu.memory_space<vmem>>, vector<16x32xf32>
    %261 = vector.extract_strided_slice %259 {offsets = [0, 0], sizes = [16, 32], strides = [1, 1]} : vector<32x32xf32> to vector<16x32xf32>
    %262 = vector.extract_strided_slice %259 {offsets = [16, 0], sizes = [16, 32], strides = [1, 1]} : vector<32x32xf32> to vector<16x32xf32>
    %263 = arith.subf %261, %262 : vector<16x32xf32>
    %264 = arith.mulf %263, %260 : vector<16x32xf32>
    %265 = arith.mulf %264, %264 : vector<16x32xf32>
    %266 = vector.shape_cast %265 : vector<16x32xf32> to vector<1x16x32xf32>
    %cst_113 = arith.constant dense<0.000000e+00> : vector<1xf32>
    %267 = vector.multi_reduction <add>, %266, %cst_113 [1, 2] : vector<1x16x32xf32> to vector<1xf32>
    %268 = vector.shape_cast %267 : vector<1xf32> to vector<1x1x1xf32>
    %269 = vector.extract %268[0, 0, 0] : f32 from vector<1x1x1xf32>
    %cst_114 = arith.constant 3.906250e-03 : f32
    %270 = arith.mulf %269, %cst_114 : f32
    %c0_115 = arith.constant 0 : index
    %c0_116 = arith.constant 0 : index
    %271 = memref.load %arg8[%c0_115, %c0_116] : memref<1x1xf32, #tpu.memory_space<smem>>
    memref.store %270, %arg8[%c0_115, %c0_116] : memref<1x1xf32, #tpu.memory_space<smem>>
    return
  }
}

</mosaic_0001>

<bundles_post_ra>
// kernel: dino_loss.1
= control target key start
LH: loop header
LB: loop body
LE: loop exit
PB: predicated region body
PF: predicated region fallthrough
CT: control target
= control target key end

     0   :  { %s5144_s0 = inlined_call_operand.vmem [shape: f32[32,640], index: 0, kind: input, shape index: {}]   ;;  %s5145_s1 = inlined_call_operand.vmem [shape: f32[640,32], index: 1, kind: input, shape index: {}]   ;;  %s5146_s2 = inlined_call_operand.vmem [shape: f32[80,32], index: 2, kind: input, shape index: {}]   ;;  %s5147_s3 = inlined_call_operand.vmem [shape: f32[16,128], index: 3, kind: input, shape index: {}]   ;;  %s5148_s4 = inlined_call_operand.vmem [shape: f32[2,32,96], index: 4, kind: input, shape index: {}]   ;;  %s5149_s5 = inlined_call_operand.vmem [shape: f32[4,16,32], index: 5, kind: input, shape index: {}]   ;;  %s5150_s6 = inlined_call_operand.vmem [shape: f32[2,32,128], index: 6, kind: input, shape index: {}]   ;;  %s5151_s7 = inlined_call_operand.vmem [shape: f32[2,128,32], index: 7, kind: input, shape index: {}]   ;;  %s5152_s8 = inlined_call_operand.hbm [shape: f32[1,1], index: 8, kind: output, shape index: {}]  }
   0x1   :  { %v66_v0 = vld [vmem:[%s5145_s1 + $0x80] sm:$0xff]  ;;  %v67_v1 = vld [vmem:[%s5145_s1 + $0x88] sm:$0xff]  ;;  %v68_v11 = vld [vmem:[%s5145_s1 + $0x90] sm:$0xff] }
   0x2   :  { %v50_v2 = vld [vmem:[%s5145_s1] sm:$0xff]  ;;  %v3660_v3 = vpack.c.bf16 %v67_v1, %v66_v0  ;;  %v51_v4 = vld [vmem:[%s5145_s1 + $0x8] sm:$0xff]  ;;  %v69_v13 = vld [vmem:[%s5145_s1 + $0x98] sm:$0xff] }
   0x3   :  { %v98_v5 = vld [vmem:[%s5145_s1 + $0x180] sm:$0xff]  ;;  %v99_v6 = vld [vmem:[%s5145_s1 + $0x188] sm:$0xff]  ;;  %v3662_v7 = vpack.c.bf16 %v51_v4, %v50_v2  ;;  %v52_v14 = vld [vmem:[%s5145_s1 + $0x10] sm:$0xff]  ;;  %v3664_v16 = vpack.c.bf16 %v69_v13, %v68_v11 }
   0x4   :  { %v3692_v8 = vpack.c.bf16 %v99_v6, %v98_v5  ;;  %v82_v9 = vld [vmem:[%s5145_s1 + $0x100] sm:$0xff]  ;;  %v83_v10 = vld [vmem:[%s5145_s1 + $0x108] sm:$0xff]  ;;  %3661 = vmatprep.subr.bf16.mxu0 %v3660_v3  ;;  %v53_v15 = vld [vmem:[%s5145_s1 + $0x18] sm:$0xff] }
   0x5   :  { %v3694_v12 = vpack.c.bf16 %v83_v10, %v82_v9  ;;  %3663 = vmatpush3.bf16.msra.mxu0 %v3662_v7  ;;  %v3666_v17 = vpack.c.bf16 %v53_v15, %v52_v14  ;;  %v100_v18 = vld [vmem:[%s5145_s1 + $0x190] sm:$0xff]  ;;  %v101_v19 = vld [vmem:[%s5145_s1 + $0x198] sm:$0xff]  ;;  %v70_v23 = vld [vmem:[%s5145_s1 + $0xa0] sm:$0xff] }
   0x6   :  { %3693 = vmatprep.subr.bf16.mxu1 %v3692_v8  ;;  %v84_v20 = vld [vmem:[%s5145_s1 + $0x110] sm:$0xff]  ;;  %v3696_v21 = vpack.c.bf16 %v101_v19, %v100_v18  ;;  %v85_v22 = vld [vmem:[%s5145_s1 + $0x118] sm:$0xff]  ;;  %v71_v24 = vld [vmem:[%s5145_s1 + $0xa8] sm:$0xff]  ;;  %3665 = vmatprep.subr.bf16.mxu0 %v3664_v16 }
   0x7   :  { %3695 = vmatpush3.bf16.msra.mxu1 %v3694_v12  ;;  %v3698_v25 = vpack.c.bf16 %v85_v22, %v84_v20  ;;  %v3668_v26 = vpack.c.bf16 %v71_v24, %v70_v23  ;;  %v54_v27 = vld [vmem:[%s5145_s1 + $0x20] sm:$0xff]  ;;  %v55_v28 = vld [vmem:[%s5145_s1 + $0x28] sm:$0xff]  ;;  %v72_v35 = vld [vmem:[%s5145_s1 + $0xb0] sm:$0xff] }
   0x8   :  { %v102_v29 = vld [vmem:[%s5145_s1 + $0x1a0] sm:$0xff]  ;;  %3697 = vmatprep.subr.bf16.mxu1 %v3696_v21  ;;  %v103_v30 = vld [vmem:[%s5145_s1 + $0x1a8] sm:$0xff]  ;;  %v3670_v33 = vpack.c.bf16 %v55_v28, %v54_v27  ;;  %v73_v36 = vld [vmem:[%s5145_s1 + $0xb8] sm:$0xff] }
   0x9   :  { %v86_v31 = vld [vmem:[%s5145_s1 + $0x120] sm:$0xff]  ;;  %v87_v32 = vld [vmem:[%s5145_s1 + $0x128] sm:$0xff]  ;;  %3667 = vmatpush3.bf16.msra.mxu0 %v3666_v17  ;;  %v3700_v34 = vpack.c.bf16 %v103_v30, %v102_v29  ;;  %v56_v37 = vld [vmem:[%s5145_s1 + $0x30] sm:$0xff]  ;;  %v3672_v39 = vpack.c.bf16 %v73_v36, %v72_v35 }
   0xa   :  { %3669 = vmatprep.subr.bf16.mxu0 %v3668_v26  ;;  %v3702_v38 = vpack.c.bf16 %v87_v32, %v86_v31  ;;  %v57_v40 = vld [vmem:[%s5145_s1 + $0x38] sm:$0xff]  ;;  %v104_v41 = vld [vmem:[%s5145_s1 + $0x1b0] sm:$0xff]  ;;  %v74_v46 = vld [vmem:[%s5145_s1 + $0xc0] sm:$0xff] }
   0xb   :  { %3699 = vmatpush3.bf16.msra.mxu1 %v3698_v25  ;;  %v105_v42 = vld [vmem:[%s5145_s1 + $0x1b8] sm:$0xff]  ;;  %v88_v44 = vld [vmem:[%s5145_s1 + $0x130] sm:$0xff]  ;;  %v75_v47 = vld [vmem:[%s5145_s1 + $0xc8] sm:$0xff]  ;;  %v3674_v48 = vpack.c.bf16 %v57_v40, %v56_v37 }
   0xc   :  { %3701 = vmatprep.subr.bf16.mxu1 %v3700_v34  ;;  %v3704_v43 = vpack.c.bf16 %v105_v42, %v104_v41  ;;  %v89_v45 = vld [vmem:[%s5145_s1 + $0x138] sm:$0xff]  ;;  %v106_v49 = vld [vmem:[%s5145_s1 + $0x1c0] sm:$0xff]  ;;  %v107_v50 = vld [vmem:[%s5145_s1 + $0x1c8] sm:$0xff]  ;;  %v3676_v52 = vpack.c.bf16 %v75_v47, %v74_v46 }
   0xd   :  { %3671 = vmatpush3.bf16.msra.mxu0 %v3670_v33  ;;  %v3706_v51 = vpack.c.bf16 %v89_v45, %v88_v44  ;;  %v58_v53 = vld [vmem:[%s5145_s1 + $0x40] sm:$0xff]  ;;  %v59_v54 = vld [vmem:[%s5145_s1 + $0x48] sm:$0xff]  ;;  %v3708_v56 = vpack.c.bf16 %v107_v50, %v106_v49  ;;  %v76_v58 = vld [vmem:[%s5145_s1 + $0xd0] sm:$0xff] }
   0xe   :  { %3673 = vmatprep.subr.bf16.mxu0 %v3672_v39  ;;  %v90_v55 = vld [vmem:[%s5145_s1 + $0x140] sm:$0xff]  ;;  %v91_v57 = vld [vmem:[%s5145_s1 + $0x148] sm:$0xff]  ;;  %v77_v59 = vld [vmem:[%s5145_s1 + $0xd8] sm:$0xff]  ;;  %v3678_v62 = vpack.c.bf16 %v59_v54, %v58_v53 }
   0xf   :  { %3703 = vmatpush3.bf16.msra.mxu1 %v3702_v38  ;;  %v108_v60 = vld [vmem:[%s5145_s1 + $0x1d0] sm:$0xff]  ;;  %v109_v61 = vld [vmem:[%s5145_s1 + $0x1d8] sm:$0xff]  ;;  %v3710_v63 = vpack.c.bf16 %v91_v57, %v90_v55  ;;  %v3680_v0 = vpack.c.bf16 %v77_v59, %v76_v58  ;;  %v78_v6 = vld [vmem:[%s5145_s1 + $0xe0] sm:$0xff] }
  0x10   :  { %3705 = vmatprep.subr.bf16.mxu1 %v3704_v43  ;;  %v60_v1 = vld [vmem:[%s5145_s1 + $0x50] sm:$0xff]  ;;  %v61_v2 = vld [vmem:[%s5145_s1 + $0x58] sm:$0xff]  ;;  %v3712_v4 = vpack.c.bf16 %v109_v61, %v108_v60  ;;  %v79_v7 = vld [vmem:[%s5145_s1 + $0xe8] sm:$0xff] }
  0x11   :  { %3675 = vmatpush3.bf16.msra.mxu0 %v3674_v48  ;;  %v92_v3 = vld [vmem:[%s5145_s1 + $0x150] sm:$0xff]  ;;  %v93_v5 = vld [vmem:[%s5145_s1 + $0x158] sm:$0xff]  ;;  %v110_v8 = vld [vmem:[%s5145_s1 + $0x1e0] sm:$0xff]  ;;  %v3682_v10 = vpack.c.bf16 %v61_v2, %v60_v1  ;;  %v3684_v14 = vpack.c.bf16 %v79_v7, %v78_v6 }
  0x12   :  { %3677 = vmatprep.subr.bf16.mxu0 %v3676_v52  ;;  %v111_v9 = vld [vmem:[%s5145_s1 + $0x1e8] sm:$0xff]  ;;  %v62_v11 = vld [vmem:[%s5145_s1 + $0x60] sm:$0xff]  ;;  %v3714_v13 = vpack.c.bf16 %v93_v5, %v92_v3  ;;  %v80_v19 = vld [vmem:[%s5145_s1 + $0xf0] sm:$0xff] }
  0x13   :  { %3707 = vmatpush3.bf16.msra.mxu1 %v3706_v51  ;;  %v31_v12 = vld [vmem:[%s5144_s0 + $0x8] sm:$0xff]  ;;  %v94_v16 = vld [vmem:[%s5145_s1 + $0x160] sm:$0xff]  ;;  %v3716_v18 = vpack.c.bf16 %v111_v9, %v110_v8  ;;  %v81_v20 = vld [vmem:[%s5145_s1 + $0xf8] sm:$0xff] }
  0x14   :  { %3709 = vmatprep.subr.bf16.mxu1 %v3708_v56  ;;  %v63_v15 = vld [vmem:[%s5145_s1 + $0x68] sm:$0xff]  ;;  %198 = vmatprep.mubr.f32.mxu0 %v31_v12  ;;  %v33_v21 = vld [vmem:[%s5144_s0 + $0x18] sm:$0xff]  ;;  %v112_v22 = vld [vmem:[%s5145_s1 + $0x1f0] sm:$0xff]  ;;  %v3688_v26 = vpack.c.bf16 %v81_v20, %v80_v19 }
  0x15   :  { %3679 = vmatpush3.bf16.msra.mxu0 %v3678_v62  ;;  %v95_v17 = vld [vmem:[%s5145_s1 + $0x168] sm:$0xff]  ;;  %v113_v23 = vld [vmem:[%s5145_s1 + $0x1f8] sm:$0xff]  ;;  %283 = vmatprep.mubr.f32.mxu1 %v33_v21  ;;  %v3686_v24 = vpack.c.bf16 %v63_v15, %v62_v11  ;;  %v64_v27 = vld [vmem:[%s5145_s1 + $0x70] sm:$0xff] }
  0x16   :  { %3681 = vmatprep.subr.bf16.mxu0 %v3680_v0  ;;  %v3718_v25 = vpack.c.bf16 %v95_v17, %v94_v16  ;;  %v65_v28 = vld [vmem:[%s5145_s1 + $0x78] sm:$0xff]  ;;  %v96_v29 = vld [vmem:[%s5145_s1 + $0x170] sm:$0xff]  ;;  %v3720_v30 = vpack.c.bf16 %v113_v23, %v112_v22  ;;  %v114_v32 = vld [vmem:[%s5145_s1 + $0x200] sm:$0xff] }
  0x17   :  { %3711 = vmatpush3.bf16.msra.mxu1 %v3710_v63  ;;  %v97_v31 = vld [vmem:[%s5145_s1 + $0x178] sm:$0xff]  ;;  %v115_v33 = vld [vmem:[%s5145_s1 + $0x208] sm:$0xff]  ;;  %v3690_v34 = vpack.c.bf16 %v65_v28, %v64_v27  ;;  %v116_v37 = vld [vmem:[%s5145_s1 + $0x210] sm:$0xff] }
  0x18   :  { %3713 = vmatprep.subr.bf16.mxu1 %v3712_v4  ;;  %v3722_v35 = vpack.c.bf16 %v97_v31, %v96_v29  ;;  %v3724_v36 = vpack.c.bf16 %v115_v33, %v114_v32  ;;  %v117_v38 = vld [vmem:[%s5145_s1 + $0x218] sm:$0xff]  ;;  %v30_v39 = vld [vmem:[%s5144_s0] sm:$0xff]  ;;  %v32_v40 = vld [vmem:[%s5144_s0 + $0x10] sm:$0xff] }
  0x19   :  { %3683 = vmatpush3.bf16.msra.mxu0 %v3682_v10  ;;  %v3728_v41 = vpack.c.bf16 %v117_v38, %v116_v37 }
  0x1a   :  { %3685 = vmatprep.subr.bf16.mxu0 %v3684_v14 }
  0x1b   :  { %3715 = vmatpush3.bf16.msra.mxu1 %v3714_v13 }
  0x1c   :  { %3717 = vmatprep.subr.bf16.mxu1 %v3716_v18 }
  0x1d   :  { %3687 = vmatpush3.bf16.msra.mxu0 %v3686_v24 }
  0x1e   :  { %3689 = vmatprep.subr.bf16.mxu0 %v3688_v26 }
  0x1f   :  { %3719 = vmatpush3.bf16.msra.mxu1 %v3718_v25 }
  0x20   :  { %3721 = vmatprep.subr.bf16.mxu1 %v3720_v30 }
  0x21   :  { %3691 = vmatpush3.bf16.msra.mxu0 %v3690_v34 }
  0x22   :  { %3725 = vmatprep.subr.bf16.mxu0 %v3724_v36 }
  0x23   :  { %3723 = vmatpush3.bf16.msra.mxu1 %v3722_v35 }
  0x24   :  { %13 = vsyncpa [#allocation3], 0  ;;  %v118_v42 = vld [vmem:[%s5145_s1 + $0x220] sm:$0xff]  ;;  %v119_v43 = vld [vmem:[%s5145_s1 + $0x228] sm:$0xff]  ;;  %199 = vmatmul.mubr.f32.vlgmr.msra.gmra.mrb[0].mxu0 %v30_v39  ;;  %vm393_vm0 = vcmask 261120   ;;  %vm569_vm1 = vcmask 130048  }
  0x25   :  { %v36_v44 = vld [vmem:[%s5144_s0 + $0x30] sm:$0xff]  ;;  %v38_v45 = vld [vmem:[%s5144_s0 + $0x40] sm:$0xff]  ;;  %3727 = vmatpush3.bf16.msra.mxu0 %v3724_v36  ;;  %v35_v46 = vld [vmem:[%s5144_s0 + $0x28] sm:$0xff]  ;;  %v3732_v47 = vpack.c.bf16 %v119_v43, %v118_v42  ;;  %s4180_s23 = smov 96   ;;  %s4181_s24 = smov 112  }
  0x26   :  { %284 = vmatmul.mubr.f32.vlgmr.msra.gmra.mrb[0].mxu1 %v32_v40  ;;  %3729 = vmatprep.subr.bf16.mxu0 %v3728_v41  ;;  %v37_v48 = vld [vmem:[%s5144_s0 + $0x38] sm:$0xff]  ;;  %v120_v49 = vld [vmem:[%s5145_s1 + $0x230] sm:$0xff]  ;;  %v43_v52 = vld [vmem:[%s5144_s0 + $0x68] sm:$0xff]  ;;  %s4182_s25 = smov 80   ;;  %s4183_s10 = smov 64  }
  0x27   :  { %203 = vmatprep.mubr.f32.mxu0 %v36_v44  ;;  %v121_v50 = vld [vmem:[%s5145_s1 + $0x238] sm:$0xff]  ;;  %288 = vmatprep.mubr.f32.mxu1 %v38_v45  ;;  %v40_v53 = vld [vmem:[%s5144_s0 + $0x50] sm:$0xff]  ;;  %v42_v55 = vld [vmem:[%s5144_s0 + $0x60] sm:$0xff]  ;;  %s4184_s11 = smov 48   ;;  %s4168_s9 = scalar_lea.hbm %s5152_s8, 16 }
  0x28   :  { %v41_v51 = vld [vmem:[%s5144_s0 + $0x58] sm:$0xff]  ;;  %204 = vmatmul.mubr.f32.gmra.mrb[2].mxu0 %v35_v46  ;;  %v3736_v54 = vpack.c.bf16 %v121_v50, %v120_v49  ;;  %v122_v56 = vld [vmem:[%s5145_s1 + $0x240] sm:$0xff]  ;;  %v123_v57 = vld [vmem:[%s5145_s1 + $0x248] sm:$0xff]  ;;  %p4169_p0 = scmp.ne.s32.totalorder %s5152_s8, %s4168_s9  ;;  %p4172_p1 = scmp.lt.u32.totalorder %s4168_s9, %s5152_s8 }
  0x29   :  { %3731 = vmatpush3.bf16.msra.mxu0 %v3728_v41  ;;  %208 = vmatprep.mubr.f32.mxu0 %v41_v51  ;;  %v46_v58 = vld [vmem:[%s5144_s0 + $0x80] sm:$0xff]  ;;  %v48_v59 = vld [vmem:[%s5144_s0 + $0x90] sm:$0xff]  ;;  %v45_v60 = vld [vmem:[%s5144_s0 + $0x78] sm:$0xff]  ;;  %v3740_v61 = vpack.c.bf16 %v123_v57, %v122_v56 }
  0x2a   :  { %289 = vmatmul.mubr.f32.gmra.mrb[2].mxu1 %v37_v48  ;;  %3733 = vmatprep.subr.bf16.mxu0 %v3732_v47  ;;  %v47_v62 = vld [vmem:[%s5144_s0 + $0x88] sm:$0xff]  ;;  %v124_v63 = vld [vmem:[%s5145_s1 + $0x250] sm:$0xff]  ;;  %v125_v0 = vld [vmem:[%s5145_s1 + $0x258] sm:$0xff]  ;;  %p4174_p2 = pnand %p4172_p1, %p4169_p0 }
  0x2b   :  { %293 = vmatprep.mubr.f32.mxu1 %v43_v52  ;;  %v34_v1 = vld [vmem:[%s5144_s0 + $0x20] sm:$0xff]  ;;  %v3744_v2 = vpack.c.bf16 %v125_v0, %v124_v63  ;;  %v127_v4 = vld [vmem:[%s5145_s1 + $0x268] sm:$0xff]  ;;  %v128_v6 = vld [vmem:[%s5145_s1 + $0x270] sm:$0xff] }
  0x2c   :  { %209 = vmatmul.mubr.f32.gmra.mrb[4].mxu0 %v40_v53  ;;  %v126_v3 = vld [vmem:[%s5145_s1 + $0x260] sm:$0xff]  ;;  %v129_v7 = vld [vmem:[%s5145_s1 + $0x278] sm:$0xff]  ;;  %v39_v9 = vld [vmem:[%s5144_s0 + $0x48] sm:$0xff] }
  0x2d   :  { %3735 = vmatpush3.bf16.msra.mxu0 %v3732_v47  ;;  %213 = vmatprep.mubr.f32.mxu0 %v46_v58  ;;  %v3748_v5 = vpack.c.bf16 %v127_v4, %v126_v3  ;;  %v3752_v8 = vpack.c.bf16 %v129_v7, %v128_v6  ;;  %v44_v10 = vld [vmem:[%s5144_s0 + $0x70] sm:$0xff]  ;;  %v49_v11 = vld [vmem:[%s5144_s0 + $0x98] sm:$0xff]  ;;  %v130_v13 = vld [vmem:[%s5146_s2] sm:$0xff] }
  0x2e   :  { %294 = vmatmul.mubr.f32.gmra.mrb[4].mxu1 %v42_v55  ;;  %3737 = vmatprep.subr.bf16.mxu0 %v3736_v54  ;;  %v131_v21 = vld [vmem:[%s5146_s2 + $0x8] sm:$0xff]  ;;  %v132_v30 = vld [vmem:[%s5146_s2 + $0x10] sm:$0xff]  ;;  %v133_v39 = vld [vmem:[%s5146_s2 + $0x18] sm:$0xff] }
  0x2f   :  { %298 = vmatprep.mubr.f32.mxu1 %v48_v59  ;;  %vm4605_vm2 = vmpackc.low %vm569_vm1, %vm569_vm1 }
  0x30   :  { %214 = vmatmul.mubr.f32.gmra.mrb[6].mxu0 %v45_v60 }
  0x31   :  { %3739 = vmatpush3.bf16.msra.mxu0 %v3736_v54  ;;  %3370 = vmatprep.mubr.f32.mxu0 %v34_v1 }
  0x32   :  { %299 = vmatmul.mubr.f32.gmra.mrb[6].mxu1 %v47_v62  ;;  %3741 = vmatprep.subr.bf16.mxu0 %v3740_v61 }
  0x35   :  { %3743 = vmatpush3.bf16.msra.mxu0 %v3740_v61 }
  0x36   :  { %3745 = vmatprep.subr.bf16.mxu0 %v3744_v2 }
  0x39   :  { %3747 = vmatpush3.bf16.msra.mxu0 %v3744_v2 }
  0x3a   :  { %3749 = vmatprep.subr.bf16.mxu0 %v3748_v5 }
  0x3d   :  { %3751 = vmatpush3.bf16.msra.mxu0 %v3748_v5 }
  0x3e   :  { %3753 = vmatprep.subr.bf16.mxu0 %v3752_v8 }
  0x41   :  { %3755 = vmatpush3.bf16.msra.mxu0 %v3752_v8 }
  0x44   :  { %3371 = vmatmul.mubr.f32.vlgmr.msra.gmra.mrb[8].mxu0 %v39_v9 }
  0x45   :  { %3373 = vmatprep.mubr.f32.mxu0 %v44_v10 }
  0x48   :  { %3374 = vmatmul.mubr.f32.gmra.mrb[10].mxu0 %v49_v11 }
  0xf7   :  { %v3102_v12 = vpop.f32.mrb[0].mxu0 }
  0xf8   :  { %v3103_v14 = vpop.f32.mrb[1].mxu0 }
  0xf9   :  { %v3146_v15 = vpop.f32.mrb[0].mxu1  ;;  %v3104_v16 = vadd.f32 %v3103_v14, %v3102_v12 }
  0xfa   :  { %v3147_v17 = vpop.f32.mrb[1].mxu1 }
  0xfb   :  { %v3148_v18 = vadd.f32 %v3147_v17, %v3146_v15  ;;  %v201_v19 = vadd.f32 %v3104_v16, %v130_v13  ;;  %v3105_v20 = vpop.f32.mrb[2].mxu0  ;;  %v447_v16 = vld [vmem:[%s5148_s4] sm:$0xff]  ;;  %v448_v17 = vld [vmem:[%s5148_s4 + $0x8] sm:$0xff] }
  0xfc   :  { %v3106_v22 = vpop.f32.mrb[3].mxu0 }
  0xfd   :  { %v3149_v23 = vpop.f32.mrb[2].mxu1  ;;  %v3107_v24 = vadd.f32 %v3106_v22, %v3105_v20  ;;  %v286_v26 = vadd.f32 %v3148_v18, %v201_v19  ;;  %v3756_v18 = vpack.c.bf16 %v448_v17, %v447_v16  ;;  %v449_v19 = vld [vmem:[%s5148_s4 + $0x10] sm:$0xff]  ;;  %v450_v20 = vld [vmem:[%s5148_s4 + $0x18] sm:$0xff] }
  0xfe   :  { %v3150_v25 = vpop.f32.mrb[3].mxu1 }
  0xff   :  { %v3151_v27 = vadd.f32 %v3150_v25, %v3149_v23  ;;  %v206_v28 = vadd.f32 %v3107_v24, %v131_v21  ;;  %v3108_v29 = vpop.f32.mrb[4].mxu0  ;;  %3757 = vmatprep.subr.bf16.mxu0 %v3756_v18  ;;  %v3760_v21 = vpack.c.bf16 %v450_v20, %v449_v19  ;;  %v389_v19 = vld [vmem:[%s5146_s2 + $0x20] sm:$0xff] }
 0x100   :  { %v3109_v31 = vpop.f32.mrb[5].mxu0  ;;  %3759 = vmatpush3.bf16.msra.mxu0 %v3756_v18  ;;  %v390_v18 = vld [vmem:[%s5146_s2 + $0x28] sm:$0xff] }
 0x101   :  { %v3152_v32 = vpop.f32.mrb[4].mxu1  ;;  %v3110_v33 = vadd.f32 %v3109_v31, %v3108_v29  ;;  %v291_v35 = vadd.f32 %v3151_v27, %v206_v28  ;;  %3761 = vmatprep.subr.bf16.mxu0 %v3760_v21 }
 0x102   :  { %v3153_v34 = vpop.f32.mrb[5].mxu1 }
 0x103   :  { %v3154_v36 = vadd.f32 %v3153_v34, %v3152_v32  ;;  %v211_v37 = vadd.f32 %v3110_v33, %v132_v30  ;;  %v3111_v38 = vpop.f32.mrb[6].mxu0 }
 0x104   :  { %v3112_v40 = vpop.f32.mrb[7].mxu0  ;;  %3763 = vmatpush3.bf16.msra.mxu0 %v3760_v21 }
 0x105   :  { %v3155_v41 = vpop.f32.mrb[6].mxu1  ;;  %v3113_v42 = vadd.f32 %v3112_v40, %v3111_v38  ;;  %v296_v44 = vadd.f32 %v3154_v36, %v211_v37 }
 0x106   :  { %v3156_v43 = vpop.f32.mrb[7].mxu1 }
 0x107   :  { %v3157_v45 = vadd.f32 %v3156_v43, %v3155_v41  ;;  %v216_v46 = vadd.f32 %v3113_v42, %v133_v39  ;;  %v2950_v42 = vld [vmem:[%s5147_s3] ss:$0 sm:$0xff] }
 0x109   :  { %v301_v47 = vadd.f32 %v3157_v45, %v216_v46 }
 0x117   :  { %v3372_v48 = vpop.f32.mrb[8].mxu0 }
 0x118   :  { %v4543_v49 = vadd.f32 %v3372_v48, %v291_v35  ;;  %v370_v50 = vpop.f32.mrb[9].mxu0 }
 0x119   :  { %v4545_v51 = vadd.f32 %v370_v50, %v286_v26 }
 0x11a   :  { %v397_v58 = vsel %vm393_vm0, %v4543_v49, 0.0 }
 0x11b   :  { %v3375_v52 = vpop.f32.mrb[10].mxu0  ;;  %v394_v53 = vsel %vm393_vm0, %v4545_v51, 0.0 }
 0x11c   :  { %v4549_v54 = vadd.f32 %v3375_v52, %v301_v47  ;;  %v380_v55 = vpop.f32.mrb[11].mxu0  ;;  %395 = vadd.xlane.f32.xlu0 %v394_v53 }
 0x11d   :  { %v4551_v56 = vadd.f32 %v380_v55, %v296_v44 }
 0x11e   :  { %v403_v59 = vsel %vm393_vm0, %v4549_v54, 0.0 }
 0x11f   :  { %v400_v57 = vsel %vm393_vm0, %v4551_v56, 0.0 }
 0x120   :  { %401 = vadd.xlane.f32.xlu1 %v400_v57  ;;  %398 = vadd.xlane.f32.xlu0 %v397_v58 }
 0x124   :  { %404 = vadd.xlane.f32.xlu1 %v403_v59 }
 0x1a9   :  { %v396_v60 = vpop.xlane.xlu0 %395 }
 0x1aa   :  { %v407_v61 = vmul.f32 0.03125, %v396_v60 }
 0x1ac   :  { %v411_v62 = vsub.f32 %v4545_v51, %v407_v61 }
 0x1ad   :  { %v402_v63 = vpop.xlane.xlu1 %401  ;;  %v399_v0 = vpop.xlane.xlu0 %398 }
 0x1ae   :  { %v409_v1 = vmul.f32 0.03125, %v402_v63  ;;  %v408_v2 = vmul.f32 0.03125, %v399_v0  ;;  %v415_v3 = vmul.f32 %v411_v62, %v411_v62  ;;  %v4165_v0 = vld [vmem:[%s5146_s2 + $0x20] sm:$0xff] }
 0x1b0   :  { %v413_v4 = vsub.f32 %v4551_v56, %v409_v1  ;;  %v412_v5 = vsub.f32 %v4543_v49, %v408_v2  ;;  %v419_v6 = vsel %vm393_vm0, %v415_v3, 0.0 }
 0x1b1   :  { %v405_v7 = vpop.xlane.xlu1 %404  ;;  %420 = vadd.xlane.f32.xlu0 %v419_v6 }
 0x1b2   :  { %v410_v8 = vmul.f32 0.03125, %v405_v7  ;;  %v417_v9 = vmul.f32 %v413_v4, %v413_v4  ;;  %v416_v10 = vmul.f32 %v412_v5, %v412_v5 }
 0x1b4   :  { %v414_v11 = vsub.f32 %v4549_v54, %v410_v8  ;;  %v425_v12 = vsel %vm393_vm0, %v417_v9, 0.0  ;;  %v422_v13 = vsel %vm393_vm0, %v416_v10, 0.0 }
 0x1b5   :  { %426 = vadd.xlane.f32.xlu0 %v425_v12  ;;  %423 = vadd.xlane.f32.xlu1 %v422_v13 }
 0x1b6   :  { %v418_v14 = vmul.f32 %v414_v11, %v414_v11 }
 0x1b8   :  { %v428_v15 = vsel %vm393_vm0, %v418_v14, 0.0 }
 0x1b9   :  { %429 = vadd.xlane.f32.xlu1 %v428_v15 }
 0x23e   :  { %v421_v22 = vpop.xlane.xlu0 %420 }
 0x23f   :  { %v431_v23 = vmul.f32 0.03125, %v421_v22 }
 0x241   :  { %v435_v24 = vadd.f32 1e-06, %v431_v23 }
 0x242   :  { %v424_v25 = vpop.xlane.xlu1 %423  ;;  %v427_v26 = vpop.xlane.xlu0 %426 }
 0x243   :  { %4044 = vrsqrt.f32 %v435_v24  ;;  %v432_v27 = vmul.f32 0.03125, %v424_v25  ;;  %v433_v28 = vmul.f32 0.03125, %v427_v26  ;;  %v392_v24 = vld [vmem:[%s5146_s2 + $0x38] sm:$0xff] }
 0x245   :  { %v436_v29 = vadd.f32 1e-06, %v432_v27  ;;  %v437_v30 = vadd.f32 1e-06, %v433_v28 }
 0x246   :  { %v430_v31 = vpop.xlane.xlu1 %429 }
 0x247   :  { %4046 = vrsqrt.f32 %v436_v29  ;;  %v434_v32 = vmul.f32 0.03125, %v430_v31 }
 0x248   :  { %4048 = vrsqrt.f32 %v437_v30  ;;  %v4646_v30 = vld [vmem:[%s5146_s2 + $0x30] sm:$0xff] }
 0x249   :  { %v438_v33 = vadd.f32 1e-06, %v434_v32 }
 0x24b   :  { %4050 = vrsqrt.f32 %v438_v33 }
 0x24d   :  { %v4045_v34 = vpop.eup %4044 }
 0x24e   :  { %v443_v35 = vmul.f32 %v4045_v34, %v411_v62 }
 0x250   :  { %3384 = vmatprep.mubr.msk.f32.mxu0 %vm393_vm0, %v443_v35 }
 0x251   :  { %v4047_v36 = vpop.eup %4046 }
 0x252   :  { %v4049_v37 = vpop.eup %4048  ;;  %v444_v38 = vmul.f32 %v4047_v36, %v412_v5 }
 0x253   :  { %v445_v39 = vmul.f32 %v4049_v37, %v413_v4 }
 0x254   :  { %3385 = vmatmul.mubr.msk.f32.vlgmr.msra.gmra.mrb[12].mxu0 %vm393_vm0, %v444_v38 }
 0x255   :  { %v4051_v40 = vpop.eup %4050  ;;  %3387 = vmatprep.mubr.msk.f32.mxu0 %vm393_vm0, %v445_v39 }
 0x256   :  { %v446_v41 = vmul.f32 %v4051_v40, %v414_v11 }
 0x258   :  { %3388 = vmatmul.mubr.msk.f32.gmra.mrb[14].mxu0 %vm393_vm0, %v446_v41 }
 0x327   :  { %v3386_v43 = vpop.f32.mrb[12].mxu0 }
 0x328   :  { %v540_v44 = vadd.f32 %v3386_v43, %v2950_v42  ;;  %v534_v45 = vpop.f32.mrb[13].mxu0 }
 0x329   :  { %v535_v46 = vadd.f32 %v2950_v42, %v534_v45 }
 0x32a   :  { %v554_v59 = vmul.f32 0.25, %v540_v44 }
 0x32b   :  { %v3389_v47 = vpop.f32.mrb[14].mxu0  ;;  %v4586_v48 = vpack.i.bf16 %v540_v44, %v535_v46  ;;  %v553_v50 = vmul.f32 0.25, %v535_v46 }
 0x32c   :  { %v550_v52 = vadd.f32 %v3389_v47, %v2950_v42  ;;  %v544_v53 = vpop.f32.mrb[15].mxu0 }
 0x32d   :  { %v545_v55 = vadd.f32 %v2950_v42, %v544_v53  ;;  %3965 = vrot.lane.b32.xlu0 %v4586_v48, %s4180_s23  ;;  %3398 = vmatprep.mubr.msk.f32.mxu1 %vm569_vm1, %v553_v50 }
 0x32e   :  { %v556_v60 = vmul.f32 0.25, %v550_v52 }
 0x32f   :  { %v4591_v57 = vpack.i.bf16 %v550_v52, %v545_v55  ;;  %v555_v58 = vmul.f32 0.25, %v545_v55 }
 0x331   :  { %830 = vrot.lane.b32.xlu0 %v553_v50, %s4181_s24  ;;  %3970 = vrot.lane.b32.xlu1 %v4591_v57, %s4180_s23 }
 0x335   :  { %3975 = vrot.lane.b32.xlu1 %v4586_v48, %s4182_s25  ;;  %834 = vrot.lane.b32.xlu0 %v555_v58, %s4181_s24 }
 0x339   :  { %3980 = vrot.lane.b32.xlu1 %v4591_v57, %s4182_s25 }
 0x33d   :  { %832 = vrot.lane.b32.xlu1 %v554_v59, %s4181_s24 }
 0x341   :  { %836 = vrot.lane.b32.xlu1 %v556_v60, %s4181_s24 }
 0x39f   :  { %v3966_v61 = vpop.permute.xlu0 %3965 }
 0x3a0   :  { %v3968_v62 = vunpack.i.h.bf16 %v3966_v61  ;;  %v3967_v63 = vunpack.i.l.bf16 %v3966_v61 }
 0x3a2   :  { %v3764_v1 = vpack.c.bf16 %v3968_v62, %v3967_v63 }
 0x3a3   :  { %v3971_v2 = vpop.permute.xlu1 %3970  ;;  %v831_v14 = vpop.permute.xlu0 %830 }
 0x3a4   :  { %v3973_v3 = vunpack.i.h.bf16 %v3971_v2  ;;  %v3972_v4 = vunpack.i.l.bf16 %v3971_v2  ;;  %3766 = vmatprep.subr.msk.bf16.mxu1 %vm4605_vm2, %v3764_v1 }
 0x3a5   :  { %3769 = vmatpush3.bf16.xpose.msk.msra.mxu1 %vm4605_vm2, %v3764_v1 }
 0x3a6   :  { %v3770_v5 = vpack.c.bf16 %v3973_v3, %v3972_v4 }
 0x3a7   :  { %v3976_v6 = vpop.permute.xlu1 %3975  ;;  %v835_v16 = vpop.permute.xlu0 %834 }
 0x3a8   :  { %v3978_v7 = vunpack.i.h.bf16 %v3976_v6  ;;  %v3977_v8 = vunpack.i.l.bf16 %v3976_v6  ;;  %3772 = vmatprep.subr.msk.bf16.mxu1 %vm4605_vm2, %v3770_v5 }
 0x3aa   :  { %v3784_v9 = vpack.c.bf16 %v3978_v7, %v3977_v8 }
 0x3ab   :  { %v3981_v10 = vpop.permute.xlu1 %3980 }
 0x3ac   :  { %v3983_v11 = vunpack.i.h.bf16 %v3981_v10  ;;  %v3982_v12 = vunpack.i.l.bf16 %v3981_v10 }
 0x3ad   :  { %3775 = vmatpush3.bf16.xpose.msk.msra.mxu1 %vm4605_vm2, %v3770_v5 }
 0x3ae   :  { %3786 = vmatprep.subr.msk.bf16.mxu1 %vm4605_vm2, %v3784_v9  ;;  %v3790_v13 = vpack.c.bf16 %v3983_v11, %v3982_v12 }
 0x3af   :  { %v833_v15 = vpop.permute.xlu1 %832 }
 0x3b3   :  { %v837_v17 = vpop.permute.xlu1 %836 }
 0x3b4   :  { %3399 = vmatmul.mubr.msk.f32.vlgmr.msra.gmra.mrb[8].mxu1 %vm569_vm1, %v554_v59 }
 0x3b5   :  { %3401 = vmatprep.mubr.msk.f32.mxu1 %vm569_vm1, %v555_v58  ;;  %3789 = vmatpush3.bf16.xpose.msk.msra.mxu1 %vm4605_vm2, %v3784_v9 }
 0x3b6   :  { %3792 = vmatprep.subr.msk.bf16.mxu1 %vm4605_vm2, %v3790_v13 }
 0x3b8   :  { %3402 = vmatmul.mubr.msk.f32.gmra.mrb[10].mxu1 %vm569_vm1, %v556_v60 }
 0x3b9   :  { %3426 = vmatprep.mubr.msk.f32.mxu1 %vm569_vm1, %v831_v14 }
 0x3bd   :  { %3795 = vmatpush3.bf16.xpose.msk.msra.mxu1 %vm4605_vm2, %v3790_v13 }
 0x3c4   :  { %3427 = vmatmul.mubr.msk.f32.vlgmr.msra.gmra.mrb[12].mxu1 %vm569_vm1, %v833_v15 }
 0x3c5   :  { %3429 = vmatprep.mubr.msk.f32.mxu1 %vm569_vm1, %v835_v16 }
 0x3c8   :  { %3430 = vmatmul.mubr.msk.f32.gmra.mrb[14].mxu1 %vm569_vm1, %v837_v17 }
 0x487   :  { %v3400_v20 = vpop.f32.mrb[8].mxu1 }
 0x488   :  { %v662_v21 = vadd.f32 %v3400_v20, %v390_v18  ;;  %v656_v22 = vpop.f32.mrb[9].mxu1 }
 0x489   :  { %v657_v23 = vadd.f32 %v656_v22, %v389_v19 }
 0x48a   :  { %v678_v25 = vsel %vm393_vm0, %v662_v21, -inf }
 0x48b   :  { %679 = vmax.xlane.f32.xlu1 %v678_v25  ;;  %v3403_v26 = vpop.f32.mrb[10].mxu1  ;;  %v675_v27 = vsel %vm393_vm0, %v657_v23, -inf }
 0x48c   :  { %v672_v28 = vadd.f32 %v3403_v26, %v392_v24  ;;  %v666_v29 = vpop.f32.mrb[11].mxu1  ;;  %676 = vmax.xlane.f32.xlu0 %v675_v27 }
 0x48d   :  { %v667_v32 = vadd.f32 %v666_v29, %v4646_v30 }
 0x48e   :  { %v684_v31 = vsel %vm393_vm0, %v672_v28, -inf }
 0x48f   :  { %v681_v33 = vsel %vm393_vm0, %v667_v32, -inf }
 0x490   :  { %685 = vmax.xlane.f32.xlu0 %v684_v31 }
 0x494   :  { %682 = vmax.xlane.f32.xlu0 %v681_v33 }
 0x497   :  { %v3428_v34 = vpop.f32.mrb[12].mxu1 }
 0x498   :  { %v934_v35 = vadd.f32 %v3428_v34, %v390_v18  ;;  %v928_v36 = vpop.f32.mrb[13].mxu1 }
 0x499   :  { %v929_v37 = vadd.f32 %v928_v36, %v389_v19 }
 0x49a   :  { %v950_v38 = vsel %vm393_vm0, %v934_v35, -inf }
 0x49b   :  { %951 = vmax.xlane.f32.xlu1 %v950_v38  ;;  %v3431_v39 = vpop.f32.mrb[14].mxu1  ;;  %v947_v40 = vsel %vm393_vm0, %v929_v37, -inf }
 0x49c   :  { %v944_v41 = vadd.f32 %v3431_v39, %v392_v24  ;;  %v938_v42 = vpop.f32.mrb[15].mxu1  ;;  %948 = vmax.xlane.f32.xlu0 %v947_v40 }
 0x49d   :  { %v939_v43 = vadd.f32 %v938_v42, %v4646_v30 }
 0x49e   :  { %v956_v44 = vsel %vm393_vm0, %v944_v41, -inf }
 0x49f   :  { %957 = vmax.xlane.f32.xlu1 %v956_v44  ;;  %v953_v45 = vsel %vm393_vm0, %v939_v43, -inf }
 0x4a0   :  { %954 = vmax.xlane.f32.xlu0 %v953_v45 }
 0x518   :  { %v680_v46 = vpop.xlane.xlu1 %679 }
 0x519   :  { %v688_v47 = vsub.f32 %v662_v21, %v680_v46  ;;  %v677_v50 = vpop.xlane.xlu0 %676 }
 0x51a   :  { %v687_v52 = vsub.f32 %v657_v23, %v677_v50 }
 0x51b   :  { %v693_v53 = vmul.f32 1.442695, %v688_v47 }
 0x51c   :  { %v691_v55 = vmul.f32 1.442695, %v687_v52 }
 0x51d   :  { %4052 = vpow2.f32 %v693_v53  ;;  %v686_v58 = vpop.xlane.xlu0 %685 }
 0x51e   :  { %4054 = vpow2.f32 %v691_v55  ;;  %v690_v59 = vsub.f32 %v672_v28, %v686_v58 }
 0x520   :  { %v697_v60 = vmul.f32 1.442695, %v690_v59 }
 0x521   :  { %v683_v61 = vpop.xlane.xlu0 %682 }
 0x522   :  { %4056 = vpow2.f32 %v697_v60  ;;  %v689_v62 = vsub.f32 %v667_v32, %v683_v61 }
 0x524   :  { %v695_v63 = vmul.f32 1.442695, %v689_v62 }
 0x526   :  { %4058 = vpow2.f32 %v695_v63 }
 0x527   :  { %v4656_v1 = vpop.eup %4052 }
 0x528   :  { %v4055_v2 = vpop.eup %4054  ;;  %v952_v3 = vpop.xlane.xlu1 %951  ;;  %v702_v4 = vsel %vm393_vm0, %v4656_v1, 0.0 }
 0x529   :  { %v960_v5 = vsub.f32 %v934_v35, %v952_v3  ;;  %703 = vadd.xlane.f32.xlu1 %v702_v4  ;;  %v949_v6 = vpop.xlane.xlu0 %948  ;;  %v699_v7 = vsel %vm393_vm0, %v4055_v2, 0.0 }
 0x52a   :  { %v959_v8 = vsub.f32 %v929_v37, %v949_v6  ;;  %700 = vadd.xlane.f32.xlu0 %v699_v7 }
 0x52b   :  { %v965_v9 = vmul.f32 1.442695, %v960_v5 }
 0x52c   :  { %v4661_v10 = vpop.eup %4056  ;;  %v963_v11 = vmul.f32 1.442695, %v959_v8  ;;  %v958_v12 = vpop.xlane.xlu1 %957 }
 0x52d   :  { %4060 = vpow2.f32 %v965_v9  ;;  %v962_v13 = vsub.f32 %v944_v41, %v958_v12  ;;  %v955_v14 = vpop.xlane.xlu0 %954  ;;  %v708_v15 = vsel %vm393_vm0, %v4661_v10, 0.0  ;;  %v2980_v12 = vld [vmem:[%s5149_s5 + $0x18] sm:$0xff] }
 0x52e   :  { %4062 = vpow2.f32 %v963_v11  ;;  %v961_v16 = vsub.f32 %v939_v43, %v955_v14  ;;  %709 = vadd.xlane.f32.xlu1 %v708_v15  ;;  %v2979_v11 = vld [vmem:[%s5149_s5 + $0x10] sm:$0xff]  ;;  %v828_v14 = vld [vmem:[%s5149_s5] sm:$0xff]  ;;  %v829_v15 = vld [vmem:[%s5149_s5 + $0x8] sm:$0xff] }
 0x52f   :  { %v969_v17 = vmul.f32 1.442695, %v962_v13  ;;  %v3804_v13 = vpack.c.bf16 %v2980_v12, %v2979_v11 }
 0x530   :  { %v4665_v18 = vpop.eup %4058  ;;  %v967_v19 = vmul.f32 1.442695, %v961_v16  ;;  %v3808_v16 = vpack.c.bf16 %v829_v15, %v828_v14 }
 0x531   :  { %4064 = vpow2.f32 %v969_v17  ;;  %v705_v20 = vsel %vm393_vm0, %v4665_v18, 0.0 }
 0x532   :  { %4066 = vpow2.f32 %v967_v19  ;;  %706 = vadd.xlane.f32.xlu0 %v705_v20 }
 0x537   :  { %v4669_v21 = vpop.eup %4060 }
 0x538   :  { %v4671_v22 = vpop.eup %4062  ;;  %v974_v23 = vsel %vm393_vm0, %v4669_v21, 0.0 }
 0x539   :  { %975 = vadd.xlane.f32.xlu1 %v974_v23  ;;  %v971_v24 = vsel %vm393_vm0, %v4671_v22, 0.0 }
 0x53a   :  { %972 = vadd.xlane.f32.xlu0 %v971_v24 }
 0x53b   :  { %v4677_v25 = vpop.eup %4064 }
 0x53c   :  { %v4679_v26 = vpop.eup %4066  ;;  %v980_v27 = vsel %vm393_vm0, %v4677_v25, 0.0 }
 0x53d   :  { %981 = vadd.xlane.f32.xlu1 %v980_v27  ;;  %v977_v28 = vsel %vm393_vm0, %v4679_v26, 0.0 }
 0x53e   :  { %978 = vadd.xlane.f32.xlu0 %v977_v28 }
 0x54e   :  { %3990 = vrot.lane.b32.xlu1 %v4591_v57, %s4183_s10 }
 0x552   :  { %3995 = vrot.lane.b32.xlu1 %v4586_v48, %s4184_s11 }
 0x554   :  { %3985 = vrot.lane.b32.xlu0 %v4586_v48, %s4183_s10 }
 0x556   :  { %4000 = vrot.lane.b32.xlu1 %v4591_v57, %s4184_s11 }
 0x5b6   :  { %v704_v31 = vpop.xlane.xlu1 %703 }
 0x5b7   :  { %v701_v29 = vpop.xlane.xlu0 %700 }
 0x5b8   :  { %4068 = vrcp.f32 %v701_v29 }
 0x5b9   :  { %4070 = vrcp.f32 %v704_v31 }
 0x5bb   :  { %v710_v33 = vpop.xlane.xlu1 %709 }
 0x5bf   :  { %v707_v34 = vpop.xlane.xlu0 %706 }
 0x5c0   :  { %4072 = vrcp.f32 %v707_v34 }
 0x5c1   :  { %4074 = vrcp.f32 %v710_v33 }
 0x5c2   :  { %v4069_v32 = vpop.eup %4068 }
 0x5c3   :  { %v712_v35 = vmul.f32 %v4069_v32, %v4055_v2  ;;  %v4071_v53 = vpop.eup %4070 }
 0x5c4   :  { %v714_v61 = vmul.f32 %v4071_v53, %v4656_v1 }
 0x5c5   :  { %3412 = vmatprep.mubr.msk.f32.mxu0 %vm393_vm0, %v712_v35 }
 0x5c6   :  { %v976_v36 = vpop.xlane.xlu1 %975 }
 0x5c7   :  { %v973_v37 = vpop.xlane.xlu0 %972 }
 0x5c8   :  { %4076 = vrcp.f32 %v973_v37 }
 0x5c9   :  { %4078 = vrcp.f32 %v976_v36 }
 0x5ca   :  { %v982_v38 = vpop.xlane.xlu1 %981  ;;  %v4073_v55 = vpop.eup %4072 }
 0x5cb   :  { %v979_v39 = vpop.xlane.xlu0 %978  ;;  %v4075_v62 = vpop.eup %4074  ;;  %v716_v63 = vmul.f32 %v4073_v55, %v4665_v18 }
 0x5cc   :  { %4080 = vrcp.f32 %v979_v39  ;;  %v718_v4 = vmul.f32 %v4075_v62, %v4661_v10 }
 0x5cd   :  { %4082 = vrcp.f32 %v982_v38 }
 0x5ce   :  { %v3991_v40 = vpop.permute.xlu1 %3990 }
 0x5cf   :  { %v3986_v48 = vpop.permute.xlu0 %3985  ;;  %v3993_v41 = vunpack.i.h.bf16 %v3991_v40  ;;  %v3992_v42 = vunpack.i.l.bf16 %v3991_v40 }
 0x5d0   :  { %v3988_v57 = vunpack.i.h.bf16 %v3986_v48  ;;  %v3987_v43 = vunpack.i.l.bf16 %v3986_v48 }
 0x5d1   :  { %v3780_v46 = vpack.c.bf16 %v3993_v41, %v3992_v42 }
 0x5d2   :  { %v3776_v44 = vpack.c.bf16 %v3988_v57, %v3987_v43  ;;  %v3996_v45 = vpop.permute.xlu1 %3995  ;;  %v4077_v2 = vpop.eup %4076 }
 0x5d3   :  { %v3998_v47 = vunpack.i.h.bf16 %v3996_v45  ;;  %v3997_v50 = vunpack.i.l.bf16 %v3996_v45  ;;  %v4079_v5 = vpop.eup %4078  ;;  %v984_v6 = vmul.f32 %v4077_v2, %v4671_v22  ;;  %v1363_v2 = vld [vmem:[%s5150_s6 + $0x8] sm:$0xff] }
 0x5d4   :  { %3777 = vmatprep.subr.bf16.mxu0 %v3776_v44  ;;  %v986_v1 = vmul.f32 %v4079_v5, %v4669_v21  ;;  %v1365_v5 = vld [vmem:[%s5150_s6 + $0x18] sm:$0xff] }
 0x5d5   :  { %3779 = vmatpush3.bf16.msra.mxu0 %v3776_v44  ;;  %v3796_v58 = vpack.c.bf16 %v3998_v47, %v3997_v50 }
 0x5d6   :  { %v4001_v52 = vpop.permute.xlu1 %4000  ;;  %3781 = vmatprep.subr.bf16.mxu0 %v3780_v46  ;;  %v4081_v7 = vpop.eup %4080 }
 0x5d7   :  { %v4003_v59 = vunpack.i.h.bf16 %v4001_v52  ;;  %v4002_v60 = vunpack.i.l.bf16 %v4001_v52  ;;  %v4083_v8 = vpop.eup %4082  ;;  %v988_v9 = vmul.f32 %v4081_v7, %v4679_v26  ;;  %v2989_v26 = vld [vmem:[%s5147_s3 + $0x2] ss:$0 sm:$0xff] }
 0x5d8   :  { %v990_v10 = vmul.f32 %v4083_v8, %v4677_v25 }
 0x5d9   :  { %3783 = vmatpush3.bf16.msra.mxu0 %v3780_v46  ;;  %v3800_v3 = vpack.c.bf16 %v4003_v59, %v4002_v60 }
 0x5da   :  { %3797 = vmatprep.subr.bf16.mxu0 %v3796_v58 }
 0x5dc   :  { %3413 = vmatmul.mubr.msk.f32.vlgmr.msra.gmra.mrb[16].mxu0 %vm393_vm0, %v714_v61 }
 0x5dd   :  { %3415 = vmatprep.mubr.msk.f32.mxu0 %vm393_vm0, %v716_v63  ;;  %3799 = vmatpush3.bf16.msra.mxu0 %v3796_v58  ;;  %v1362_v63 = vld [vmem:[%s5150_s6] sm:$0xff] }
 0x5de   :  { %3801 = vmatprep.subr.bf16.mxu0 %v3800_v3 }
 0x5e0   :  { %3416 = vmatmul.mubr.msk.f32.gmra.mrb[18].mxu0 %vm393_vm0, %v718_v4  ;;  %v1364_v4 = vld [vmem:[%s5150_s6 + $0x10] sm:$0xff] }
 0x5e1   :  { %3803 = vmatpush3.bf16.msra.mxu0 %v3800_v3  ;;  %3440 = vmatprep.mubr.msk.f32.mxu0 %vm393_vm0, %v984_v6  ;;  %v3812_v3 = vpack.c.bf16 %v1363_v2, %v1362_v63  ;;  %v3816_v6 = vpack.c.bf16 %v1365_v5, %v1364_v4 }
 0x5e2   :  { %3805 = vmatprep.subr.bf16.mxu0 %v3804_v13 }
 0x5e3   :  { %3813 = vmatprep.subr.bf16.mxu1 %v3812_v3 }
 0x5e4   :  { %3441 = vmatmul.mubr.msk.f32.vlgmr.msra.gmra.mrb[20].mxu0 %vm393_vm0, %v986_v1  ;;  %3815 = vmatpush3.bf16.msra.mxu1 %v3812_v3 }
 0x5e5   :  { %3443 = vmatprep.mubr.msk.f32.mxu0 %vm393_vm0, %v988_v9  ;;  %3807 = vmatpush3.bf16.msra.mxu0 %v3804_v13 }
 0x5e6   :  { %3809 = vmatprep.subr.bf16.mxu0 %v3808_v16  ;;  %3817 = vmatprep.subr.bf16.mxu1 %v3816_v6 }
 0x5e8   :  { %3444 = vmatmul.mubr.msk.f32.gmra.mrb[22].mxu0 %vm393_vm0, %v990_v10  ;;  %3819 = vmatpush3.bf16.msra.mxu1 %v3816_v6 }
 0x6af   :  { %v3414_v17 = vpop.f32.mrb[16].mxu0 }
 0x6b0   :  { %v809_v18 = vpop.f32.mrb[17].mxu0 }
 0x6b3   :  { %v3417_v19 = vpop.f32.mrb[18].mxu0 }
 0x6b4   :  { %v819_v20 = vpop.f32.mrb[19].mxu0 }
 0x6b7   :  { %v3442_v21 = vpop.f32.mrb[20].mxu0 }
 0x6b8   :  { %v1081_v22 = vpop.f32.mrb[21].mxu0 }
 0x6b9   :  { %3450 = vmatprep.mubr.msk.f32.mxu0 %vm569_vm1, %v1081_v22 }
 0x6ba   :  { %3451 = vmatmul.mubr.msk.f32.vlgmr.msra.gmra.mrb[24].mxu0 %vm569_vm1, %v3442_v21 }
 0x6bb   :  { %v3445_v23 = vpop.f32.mrb[22].mxu0  ;;  %3811 = vmatpush3.bf16.msra.mxu0 %v3808_v16 }
 0x6bc   :  { %v1091_v24 = vpop.f32.mrb[23].mxu0 }
 0x6bd   :  { %3453 = vmatprep.mubr.msk.f32.mxu0 %vm569_vm1, %v1091_v24 }
 0x6be   :  { %3454 = vmatmul.mubr.msk.f32.gmra.mrb[26].mxu0 %vm569_vm1, %v3445_v23 }
 0x6bf   :  { %3460 = vmatprep.mubr.msk.f32.mxu0 %vm569_vm1, %v809_v18 }
 0x6c2   :  { %3461 = vmatmul.mubr.msk.f32.vlgmr.msra.gmra.mrb[24].mxu0 %vm569_vm1, %v3414_v17 }
 0x6c3   :  { %3463 = vmatprep.mubr.msk.f32.mxu0 %vm569_vm1, %v819_v20 }
 0x6c6   :  { %3464 = vmatmul.mubr.msk.f32.gmra.mrb[26].mxu0 %vm569_vm1, %v3417_v19 }
 0x795   :  { %v3462_v25 = vpop.f32.mrb[24].mxu0 }
 0x796   :  { %v1298_v27 = vadd.f32 %v3462_v25, %v4543_v49  ;;  %v1278_v28 = vpop.f32.mrb[25].mxu0 }
 0x797   :  { %v1297_v29 = vadd.f32 %v1278_v28, %v4545_v51 }
 0x798   :  { %v4733_v31 = vadd.f32 %v2989_v26, %v1298_v27  ;;  %v1505_v27 = vld [vmem:[%s5151_s7 + $0x8] sm:$0xff] }
 0x799   :  { %v4735_v32 = vadd.f32 %v2989_v26, %v1297_v29  ;;  %v3465_v33 = vpop.f32.mrb[26].mxu0  ;;  %v1506_v29 = vld [vmem:[%s5151_s7 + $0x10] sm:$0xff] }
 0x79a   :  { %v1288_v34 = vpop.f32.mrb[27].mxu0  ;;  %v1313_v35 = vsel %vm393_vm0, %v4733_v31, 0.0  ;;  %v1300_v36 = vadd.f32 %v3465_v33, %v4549_v54  ;;  %v1507_v33 = vld [vmem:[%s5151_s7 + $0x18] sm:$0xff] }
 0x79b   :  { %v1299_v37 = vadd.f32 %v1288_v34, %v4551_v56  ;;  %1314 = vadd.xlane.f32.xlu1 %v1313_v35  ;;  %v1310_v49 = vsel %vm393_vm0, %v4735_v32, 0.0  ;;  %v3824_v34 = vpack.c.bf16 %v1507_v33, %v1506_v29  ;;  %v1508_v35 = vld [vmem:[%s5151_s7 + $0x20] sm:$0xff] }
 0x79c   :  { %1311 = vadd.xlane.f32.xlu0 %v1310_v49  ;;  %v4745_v51 = vadd.f32 %v2989_v26, %v1300_v36  ;;  %v1509_v36 = vld [vmem:[%s5151_s7 + $0x28] sm:$0xff]  ;;  %v1510_v49 = vld [vmem:[%s5151_s7 + $0x30] sm:$0xff] }
 0x79d   :  { %v4743_v38 = vadd.f32 %v2989_v26, %v1299_v37  ;;  %v1504_v26 = vld [vmem:[%s5151_s7] sm:$0xff]  ;;  %v3828_v37 = vpack.c.bf16 %v1509_v36, %v1508_v35 }
 0x79e   :  { %v1319_v40 = vsel %vm393_vm0, %v4745_v51, 0.0  ;;  %v3820_v28 = vpack.c.bf16 %v1505_v27, %v1504_v26 }
 0x79f   :  { %v1316_v39 = vsel %vm393_vm0, %v4743_v38, 0.0 }
 0x7a0   :  { %1317 = vadd.xlane.f32.xlu0 %v1316_v39  ;;  %3821 = vmatprep.subr.bf16.mxu1 %v3820_v28  ;;  %v1511_v39 = vld [vmem:[%s5151_s7 + $0x38] sm:$0xff] }
 0x7a4   :  { %1320 = vadd.xlane.f32.xlu0 %v1319_v40  ;;  %v3832_v40 = vpack.c.bf16 %v1511_v39, %v1510_v49 }
 0x828   :  { %v1315_v54 = vpop.xlane.xlu1 %1314 }
 0x829   :  { %v1323_v48 = vmul.f32 0.03125, %v1315_v54  ;;  %v1312_v56 = vpop.xlane.xlu0 %1311  ;;  %v1512_v54 = vld [vmem:[%s5151_s7 + $0x40] sm:$0xff] }
 0x82a   :  { %v1322_v41 = vmul.f32 0.03125, %v1312_v56 }
 0x82b   :  { %v1327_v42 = vsub.f32 %v4733_v31, %v1323_v48  ;;  %v1513_v48 = vld [vmem:[%s5151_s7 + $0x48] sm:$0xff] }
 0x82c   :  { %v1326_v57 = vsub.f32 %v4735_v32, %v1322_v41  ;;  %v3836_v56 = vpack.c.bf16 %v1513_v48, %v1512_v54  ;;  %v1514_v41 = vld [vmem:[%s5151_s7 + $0x50] sm:$0xff]  ;;  %v2995_v54 = vld [vmem:[%s5147_s3 + $0x6] ss:$0 sm:$0xff] }
 0x82d   :  { %v1318_v43 = vpop.xlane.xlu0 %1317  ;;  %v1331_v44 = vmul.f32 %v1327_v42, %v1327_v42 }
 0x82e   :  { %v1324_v45 = vmul.f32 0.03125, %v1318_v43  ;;  %v1330_v46 = vmul.f32 %v1326_v57, %v1326_v57  ;;  %v1516_v43 = vld [vmem:[%s5151_s7 + $0x60] sm:$0xff] }
 0x82f   :  { %v1337_v47 = vsel %vm393_vm0, %v1331_v44, 0.0  ;;  %v1517_v44 = vld [vmem:[%s5151_s7 + $0x68] sm:$0xff] }
 0x830   :  { %v1328_v50 = vsub.f32 %v4743_v38, %v1324_v45  ;;  %1338 = vadd.xlane.f32.xlu1 %v1337_v47  ;;  %v1334_v52 = vsel %vm393_vm0, %v1330_v46, 0.0  ;;  %v3844_v45 = vpack.c.bf16 %v1517_v44, %v1516_v43  ;;  %v1518_v46 = vld [vmem:[%s5151_s7 + $0x70] sm:$0xff]  ;;  %v1519_v47 = vld [vmem:[%s5151_s7 + $0x78] sm:$0xff] }
 0x831   :  { %1335 = vadd.xlane.f32.xlu0 %v1334_v52  ;;  %v1321_v53 = vpop.xlane.xlu0 %1320  ;;  %v2990_v52 = vld [vmem:[%s5147_s3 + $0x4] ss:$0 sm:$0xff] }
 0x832   :  { %v1325_v55 = vmul.f32 0.03125, %v1321_v53  ;;  %v1332_v58 = vmul.f32 %v1328_v50, %v1328_v50 }
 0x834   :  { %v1329_v59 = vsub.f32 %v4745_v51, %v1325_v55  ;;  %v1340_v60 = vsel %vm393_vm0, %v1332_v58, 0.0 }
 0x835   :  { %1341 = vadd.xlane.f32.xlu0 %v1340_v60 }
 0x836   :  { %v1333_v61 = vmul.f32 %v1329_v59, %v1329_v59 }
 0x838   :  { %v1343_v62 = vsel %vm393_vm0, %v1333_v61, 0.0 }
 0x839   :  { %1344 = vadd.xlane.f32.xlu1 %v1343_v62 }
 0x8bd   :  { %v1339_v7 = vpop.xlane.xlu1 %1338 }
 0x8be   :  { %v1347_v1 = vmul.f32 0.03125, %v1339_v7  ;;  %v1336_v8 = vpop.xlane.xlu0 %1335 }
 0x8bf   :  { %v1346_v9 = vmul.f32 0.03125, %v1336_v8 }
 0x8c0   :  { %v1351_v10 = vadd.f32 1e-06, %v1347_v1 }
 0x8c1   :  { %v1350_v11 = vadd.f32 1e-06, %v1346_v9 }
 0x8c2   :  { %4084 = vrsqrt.f32 %v1351_v10  ;;  %v1342_v12 = vpop.xlane.xlu0 %1341 }
 0x8c3   :  { %4086 = vrsqrt.f32 %v1350_v11  ;;  %v1348_v13 = vmul.f32 0.03125, %v1342_v12 }
 0x8c5   :  { %v1352_v14 = vadd.f32 1e-06, %v1348_v13 }
 0x8c6   :  { %v1345_v15 = vpop.xlane.xlu1 %1344 }
 0x8c7   :  { %4088 = vrsqrt.f32 %v1352_v14  ;;  %v1349_v16 = vmul.f32 0.03125, %v1345_v15 }
 0x8c9   :  { %v1353_v17 = vadd.f32 1e-06, %v1349_v16 }
 0x8cb   :  { %4090 = vrsqrt.f32 %v1353_v17 }
 0x8cc   :  { %v4085_v18 = vpop.eup %4084 }
 0x8cd   :  { %v4087_v19 = vpop.eup %4086  ;;  %v1359_v21 = vmul.f32 %v4085_v18, %v1327_v42  ;;  %v1515_v42 = vld [vmem:[%s5151_s7 + $0x58] sm:$0xff] }
 0x8ce   :  { %v1358_v20 = vmul.f32 %v4087_v19, %v1326_v57  ;;  %v3840_v57 = vpack.c.bf16 %v1515_v42, %v1514_v41 }
 0x8d0   :  { %3474 = vmatprep.mubr.msk.f32.mxu1 %vm393_vm0, %v1358_v20 }
 0x8d1   :  { %v4089_v22 = vpop.eup %4088  ;;  %3475 = vmatmul.mubr.msk.f32.vlgmr.msra.gmra.mrb[16].mxu1 %vm393_vm0, %v1359_v21 }
 0x8d2   :  { %v1360_v23 = vmul.f32 %v4089_v22, %v1328_v50  ;;  %3823 = vmatpush3.bf16.msra.mxu1 %v3820_v28  ;;  %v3848_v50 = vpack.c.bf16 %v1519_v47, %v1518_v46 }
 0x8d3   :  { %3825 = vmatprep.subr.bf16.mxu1 %v3824_v34 }
 0x8d4   :  { %3477 = vmatprep.mubr.msk.f32.mxu1 %vm393_vm0, %v1360_v23 }
 0x8d5   :  { %v4091_v24 = vpop.eup %4090 }
 0x8d6   :  { %v1361_v25 = vmul.f32 %v4091_v24, %v1329_v59  ;;  %3827 = vmatpush3.bf16.msra.mxu1 %v3824_v34 }
 0x8d7   :  { %3829 = vmatprep.subr.bf16.mxu1 %v3828_v37 }
 0x8d8   :  { %3478 = vmatmul.mubr.msk.f32.gmra.mrb[18].mxu1 %vm393_vm0, %v1361_v25 }
 0x8da   :  { %3831 = vmatpush3.bf16.msra.mxu1 %v3828_v37 }
 0x8db   :  { %3833 = vmatprep.subr.bf16.mxu1 %v3832_v40 }
 0x8de   :  { %3835 = vmatpush3.bf16.msra.mxu1 %v3832_v40 }
 0x8df   :  { %3837 = vmatprep.subr.bf16.mxu1 %v3836_v56 }
 0x8e2   :  { %3839 = vmatpush3.bf16.msra.mxu1 %v3836_v56 }
 0x8e3   :  { %3841 = vmatprep.subr.bf16.mxu1 %v3840_v57 }
 0x8e6   :  { %3843 = vmatpush3.bf16.msra.mxu1 %v3840_v57 }
 0x8e7   :  { %3845 = vmatprep.subr.bf16.mxu1 %v3844_v45 }
 0x8ea   :  { %3847 = vmatpush3.bf16.msra.mxu1 %v3844_v45 }
 0x8eb   :  { %3849 = vmatprep.subr.bf16.mxu1 %v3848_v50 }
 0x8ee   :  { %3851 = vmatpush3.bf16.msra.mxu1 %v3848_v50 }
 0x9a4   :  { %v3476_v53 = vpop.f32.mrb[16].mxu1 }
 0x9a5   :  { %v1455_v55 = vadd.f32 %v3476_v53, %v2990_v52  ;;  %v1449_v58 = vpop.f32.mrb[17].mxu1 }
 0x9a6   :  { %v1450_v59 = vadd.f32 %v2990_v52, %v1449_v58 }
 0x9a7   :  { %v1469_v60 = vmul.f32 %v1455_v55, %v1455_v55 }
 0x9a8   :  { %v1468_v61 = vmul.f32 %v1450_v59, %v1450_v59 }
 0x9a9   :  { %v1473_v62 = vmul.f32 %v1469_v60, %v1455_v55 }
 0x9aa   :  { %v1472_v63 = vmul.f32 %v1468_v61, %v1450_v59 }
 0x9ab   :  { %v1477_v2 = vmul.f32 0.044715, %v1473_v62  ;;  %v3479_v3 = vpop.f32.mrb[18].mxu1 }
 0x9ac   :  { %v1476_v4 = vmul.f32 0.044715, %v1472_v63  ;;  %v1465_v5 = vadd.f32 %v3479_v3, %v2990_v52  ;;  %v1459_v6 = vpop.f32.mrb[19].mxu1 }
 0x9ad   :  { %v1481_v7 = vadd.f32 %v1477_v2, %v1455_v55  ;;  %v1460_v1 = vadd.f32 %v2990_v52, %v1459_v6 }
 0x9ae   :  { %v1480_v8 = vadd.f32 %v1476_v4, %v1450_v59  ;;  %v1471_v9 = vmul.f32 %v1465_v5, %v1465_v5 }
 0x9af   :  { %v1485_v10 = vmul.f32 0.7978846, %v1481_v7  ;;  %v1470_v11 = vmul.f32 %v1460_v1, %v1460_v1 }
 0x9b0   :  { %v1484_v12 = vmul.f32 0.7978846, %v1480_v8  ;;  %v1475_v13 = vmul.f32 %v1471_v9, %v1465_v5 }
 0x9b1   :  { %4092 = vtanh.f32 %v1485_v10  ;;  %v1474_v14 = vmul.f32 %v1470_v11, %v1460_v1 }
 0x9b2   :  { %v1479_v15 = vmul.f32 0.044715, %v1475_v13  ;;  %4094 = vtanh.f32 %v1484_v12  ;;  %v2996_v12 = vld [vmem:[%s5148_s4 + $0x20] sm:$0xff]  ;;  %v2997_v13 = vld [vmem:[%s5148_s4 + $0x28] sm:$0xff] }
 0x9b3   :  { %v1478_v16 = vmul.f32 0.044715, %v1474_v14  ;;  %v3852_v14 = vpack.c.bf16 %v2997_v13, %v2996_v12 }
 0x9b4   :  { %v1483_v17 = vadd.f32 %v1479_v15, %v1465_v5  ;;  %v2998_v15 = vld [vmem:[%s5148_s4 + $0x30] sm:$0xff] }
 0x9b5   :  { %v1482_v18 = vadd.f32 %v1478_v16, %v1460_v1  ;;  %3853 = vmatprep.subr.bf16.mxu0 %v3852_v14  ;;  %v2999_v16 = vld [vmem:[%s5148_s4 + $0x38] sm:$0xff] }
 0x9b6   :  { %v1487_v19 = vmul.f32 0.7978846, %v1483_v17  ;;  %3855 = vmatpush3.bf16.msra.mxu0 %v3852_v14  ;;  %v3856_v17 = vpack.c.bf16 %v2999_v16, %v2998_v15  ;;  %v4164_v16 = vld [vmem:[%s5146_s2 + $0x28] sm:$0xff] }
 0x9b7   :  { %v1486_v20 = vmul.f32 0.7978846, %v1482_v18 }
 0x9b8   :  { %4096 = vtanh.f32 %v1487_v19  ;;  %3857 = vmatprep.subr.bf16.mxu0 %v3856_v17 }
 0x9b9   :  { %4098 = vtanh.f32 %v1486_v20 }
 0x9ba   :  { %3859 = vmatpush3.bf16.msra.mxu0 %v3856_v17 }
 0x9bb   :  { %v4093_v21 = vpop.eup %4092 }
 0x9bc   :  { %v4095_v22 = vpop.eup %4094  ;;  %v1493_v23 = vadd.f32 1.0, %v4093_v21 }
 0x9bd   :  { %v1492_v24 = vadd.f32 1.0, %v4095_v22 }
 0x9be   :  { %v1497_v25 = vmul.f32 0.5, %v1493_v23 }
 0x9bf   :  { %v1496_v26 = vmul.f32 0.5, %v1492_v24 }
 0x9c0   :  { %v1501_v29 = vmul.f32 %v1497_v25, %v1455_v55 }
 0x9c1   :  { %v1500_v27 = vmul.f32 %v1496_v26, %v1450_v59 }
 0x9c2   :  { %v4097_v28 = vpop.eup %4096 }
 0x9c3   :  { %v4099_v33 = vpop.eup %4098  ;;  %3512 = vmatprep.mubr.f32.mxu1 %v1500_v27  ;;  %v1495_v34 = vadd.f32 1.0, %v4097_v28 }
 0x9c4   :  { %3513 = vmatmul.mubr.f32.vlgmr.msra.gmra.mrb[20].mxu1 %v1501_v29  ;;  %v1494_v35 = vadd.f32 1.0, %v4099_v33 }
 0x9c5   :  { %v1499_v36 = vmul.f32 0.5, %v1495_v34 }
 0x9c6   :  { %v1498_v37 = vmul.f32 0.5, %v1494_v35 }
 0x9c7   :  { %v1503_v39 = vmul.f32 %v1499_v36, %v1465_v5 }
 0x9c8   :  { %v1502_v49 = vmul.f32 %v1498_v37, %v1460_v1 }
 0x9ca   :  { %3515 = vmatprep.mubr.f32.mxu1 %v1502_v49 }
 0x9cb   :  { %3516 = vmatmul.mubr.f32.gmra.mrb[22].mxu1 %v1503_v39 }
 0xa97   :  { %v3514_v40 = vpop.f32.mrb[20].mxu1 }
 0xa98   :  { %v1606_v48 = vadd.f32 %v3514_v40, %v4733_v31  ;;  %v1586_v56 = vpop.f32.mrb[21].mxu1 }
 0xa99   :  { %v1605_v41 = vadd.f32 %v1586_v56, %v4735_v32 }
 0xa9a   :  { %v4831_v42 = vadd.f32 %v2995_v54, %v1606_v48 }
 0xa9b   :  { %v4833_v57 = vadd.f32 %v2995_v54, %v1605_v41 }
 0xa9c   :  { %v1621_v43 = vsel %vm393_vm0, %v4831_v42, 0.0 }
 0xa9d   :  { %1622 = vadd.xlane.f32.xlu1 %v1621_v43  ;;  %v1618_v44 = vsel %vm393_vm0, %v4833_v57, 0.0 }
 0xa9e   :  { %1619 = vadd.xlane.f32.xlu0 %v1618_v44  ;;  %v3517_v45 = vpop.f32.mrb[22].mxu1 }
 0xa9f   :  { %v1608_v46 = vadd.f32 %v3517_v45, %v4745_v51  ;;  %v1596_v47 = vpop.f32.mrb[23].mxu1 }
 0xaa0   :  { %v1607_v31 = vadd.f32 %v1596_v47, %v4743_v38 }
 0xaa1   :  { %v4841_v50 = vadd.f32 %v2995_v54, %v1608_v46 }
 0xaa2   :  { %v4843_v32 = vadd.f32 %v2995_v54, %v1607_v31  ;;  %v3000_v54 = vld [vmem:[%s5147_s3 + $0x1] ss:$0 sm:$0xff] }
 0xaa3   :  { %v1627_v52 = vsel %vm393_vm0, %v4841_v50, 0.0 }
 0xaa4   :  { %1628 = vadd.xlane.f32.xlu1 %v1627_v52  ;;  %v1624_v53 = vsel %vm393_vm0, %v4843_v32, 0.0 }
 0xaa5   :  { %1625 = vadd.xlane.f32.xlu0 %v1624_v53 }
 0xb2a   :  { %v1623_v55 = vpop.xlane.xlu1 %1622 }
 0xb2b   :  { %v1631_v58 = vmul.f32 0.03125, %v1623_v55  ;;  %v1620_v59 = vpop.xlane.xlu0 %1619 }
 0xb2c   :  { %v1630_v60 = vmul.f32 0.03125, %v1620_v59 }
 0xb2d   :  { %v1635_v51 = vsub.f32 %v4831_v42, %v1631_v58 }
 0xb2e   :  { %v1634_v38 = vsub.f32 %v4833_v57, %v1630_v60 }
 0xb2f   :  { %v1639_v61 = vmul.f32 %v1635_v51, %v1635_v51 }
 0xb30   :  { %v1638_v62 = vmul.f32 %v1634_v38, %v1634_v38 }
 0xb31   :  { %v1629_v63 = vpop.xlane.xlu1 %1628  ;;  %v1645_v2 = vsel %vm393_vm0, %v1639_v61, 0.0 }
 0xb32   :  { %v1633_v3 = vmul.f32 0.03125, %v1629_v63  ;;  %1646 = vadd.xlane.f32.xlu1 %v1645_v2  ;;  %v1626_v4 = vpop.xlane.xlu0 %1625  ;;  %v1642_v5 = vsel %vm393_vm0, %v1638_v62, 0.0 }
 0xb33   :  { %v1632_v6 = vmul.f32 0.03125, %v1626_v4  ;;  %1643 = vadd.xlane.f32.xlu0 %v1642_v5 }
 0xb34   :  { %v1637_v7 = vsub.f32 %v4841_v50, %v1633_v3 }
 0xb35   :  { %v1636_v1 = vsub.f32 %v4843_v32, %v1632_v6 }
 0xb36   :  { %v1641_v8 = vmul.f32 %v1637_v7, %v1637_v7 }
 0xb37   :  { %v1640_v9 = vmul.f32 %v1636_v1, %v1636_v1 }
 0xb38   :  { %v1651_v10 = vsel %vm393_vm0, %v1641_v8, 0.0 }
 0xb39   :  { %1652 = vadd.xlane.f32.xlu1 %v1651_v10  ;;  %v1648_v11 = vsel %vm393_vm0, %v1640_v9, 0.0 }
 0xb3a   :  { %1649 = vadd.xlane.f32.xlu0 %v1648_v11 }
 0xbbf   :  { %v1647_v18 = vpop.xlane.xlu1 %1646 }
 0xbc0   :  { %v1655_v19 = vmul.f32 0.03125, %v1647_v18  ;;  %v1644_v20 = vpop.xlane.xlu0 %1643 }
 0xbc1   :  { %v1654_v21 = vmul.f32 0.03125, %v1644_v20 }
 0xbc2   :  { %v1659_v22 = vadd.f32 1e-06, %v1655_v19 }
 0xbc3   :  { %v1658_v23 = vadd.f32 1e-06, %v1654_v21 }
 0xbc4   :  { %4100 = vrsqrt.f32 %v1659_v22 }
 0xbc5   :  { %4102 = vrsqrt.f32 %v1658_v23  ;;  %v4166_v23 = vld [vmem:[%s5146_s2 + $0x38] sm:$0xff] }
 0xbc6   :  { %v1653_v24 = vpop.xlane.xlu1 %1652 }
 0xbc7   :  { %v1657_v25 = vmul.f32 0.03125, %v1653_v24  ;;  %v1650_v26 = vpop.xlane.xlu0 %1649 }
 0xbc8   :  { %v1656_v27 = vmul.f32 0.03125, %v1650_v26 }
 0xbc9   :  { %v1661_v28 = vadd.f32 1e-06, %v1657_v25 }
 0xbca   :  { %v1660_v29 = vadd.f32 1e-06, %v1656_v27 }
 0xbcb   :  { %4104 = vrsqrt.f32 %v1661_v28 }
 0xbcc   :  { %4106 = vrsqrt.f32 %v1660_v29 }
 0xbce   :  { %v4101_v33 = vpop.eup %4100 }
 0xbcf   :  { %v4103_v34 = vpop.eup %4102  ;;  %v1667_v36 = vmul.f32 %v4101_v33, %v1635_v51 }
 0xbd0   :  { %v1666_v35 = vmul.f32 %v4103_v34, %v1634_v38 }
 0xbd2   :  { %3526 = vmatprep.mubr.msk.f32.mxu0 %vm393_vm0, %v1666_v35 }
 0xbd3   :  { %3527 = vmatmul.mubr.msk.f32.vlgmr.msra.gmra.mrb[28].mxu0 %vm393_vm0, %v1667_v36 }
 0xbd5   :  { %v4105_v37 = vpop.eup %4104 }
 0xbd6   :  { %v4107_v49 = vpop.eup %4106  ;;  %v1669_v40 = vmul.f32 %v4105_v37, %v1637_v7 }
 0xbd7   :  { %v1668_v39 = vmul.f32 %v4107_v49, %v1636_v1 }
 0xbd9   :  { %3529 = vmatprep.mubr.msk.f32.mxu0 %vm393_vm0, %v1668_v39 }
 0xbda   :  { %3530 = vmatmul.mubr.msk.f32.gmra.mrb[30].mxu0 %vm393_vm0, %v1669_v40 }
 0xca6   :  { %v3528_v48 = vpop.f32.mrb[28].mxu0 }
 0xca7   :  { %v1764_v56 = vadd.f32 %v3528_v48, %v3000_v54  ;;  %v1758_v41 = vpop.f32.mrb[29].mxu0 }
 0xca8   :  { %v1759_v43 = vadd.f32 %v3000_v54, %v1758_v41 }
 0xca9   :  { %v1778_v58 = vmul.f32 0.25, %v1764_v56 }
 0xcaa   :  { %v4876_v44 = vpack.i.bf16 %v1764_v56, %v1759_v43  ;;  %v1777_v45 = vmul.f32 0.25, %v1759_v43 }
 0xcac   :  { %4005 = vrot.lane.b32.xlu0 %v4876_v44, %s4180_s23  ;;  %3540 = vmatprep.mubr.msk.f32.mxu0 %vm569_vm1, %v1777_v45 }
 0xcad   :  { %v3531_v46 = vpop.f32.mrb[30].mxu0 }
 0xcae   :  { %v1774_v47 = vadd.f32 %v3531_v46, %v3000_v54  ;;  %v1768_v31 = vpop.f32.mrb[31].mxu0 }
 0xcaf   :  { %v1769_v52 = vadd.f32 %v3000_v54, %v1768_v31 }
 0xcb0   :  { %2054 = vrot.lane.b32.xlu0 %v1777_v45, %s4181_s24  ;;  %v1780_v59 = vmul.f32 0.25, %v1774_v47 }
 0xcb1   :  { %v4882_v53 = vpack.i.bf16 %v1774_v47, %v1769_v52  ;;  %v1779_v55 = vmul.f32 0.25, %v1769_v52 }
 0xcb3   :  { %4010 = vrot.lane.b32.xlu1 %v4882_v53, %s4180_s23 }
 0xcb4   :  { %2058 = vrot.lane.b32.xlu0 %v1779_v55, %s4181_s24 }
 0xcb7   :  { %4015 = vrot.lane.b32.xlu1 %v4876_v44, %s4182_s25 }
 0xcbb   :  { %4020 = vrot.lane.b32.xlu1 %v4882_v53, %s4182_s25 }
 0xcbf   :  { %2056 = vrot.lane.b32.xlu1 %v1778_v58, %s4181_s24 }
 0xcc3   :  { %2060 = vrot.lane.b32.xlu1 %v1780_v59, %s4181_s24 }
 0xd1e   :  { %v4006_v60 = vpop.permute.xlu0 %4005 }
 0xd1f   :  { %v4008_v51 = vunpack.i.h.bf16 %v4006_v60  ;;  %v4007_v38 = vunpack.i.l.bf16 %v4006_v60 }
 0xd21   :  { %v3860_v61 = vpack.c.bf16 %v4008_v51, %v4007_v38 }
 0xd22   :  { %v2055_v62 = vpop.permute.xlu0 %2054 }
 0xd23   :  { %3862 = vmatprep.subr.msk.bf16.mxu0 %vm4605_vm2, %v3860_v61  ;;  %3568 = vmatprep.mubr.msk.f32.mxu1 %vm569_vm1, %v2055_v62 }
 0xd24   :  { %3865 = vmatpush3.bf16.xpose.msk.msra.mxu0 %vm4605_vm2, %v3860_v61 }
 0xd25   :  { %v4011_v63 = vpop.permute.xlu1 %4010 }
 0xd26   :  { %v4013_v2 = vunpack.i.h.bf16 %v4011_v63  ;;  %v4012_v3 = vunpack.i.l.bf16 %v4011_v63  ;;  %v2059_v13 = vpop.permute.xlu0 %2058 }
 0xd28   :  { %v3866_v4 = vpack.c.bf16 %v4013_v2, %v4012_v3 }
 0xd29   :  { %v4016_v5 = vpop.permute.xlu1 %4015 }
 0xd2a   :  { %v4018_v6 = vunpack.i.h.bf16 %v4016_v5  ;;  %v4017_v7 = vunpack.i.l.bf16 %v4016_v5  ;;  %3868 = vmatprep.subr.msk.bf16.mxu0 %vm4605_vm2, %v3866_v4 }
 0xd2c   :  { %v3880_v1 = vpack.c.bf16 %v4018_v6, %v4017_v7  ;;  %3871 = vmatpush3.bf16.xpose.msk.msra.mxu0 %vm4605_vm2, %v3866_v4 }
 0xd2d   :  { %v4021_v8 = vpop.permute.xlu1 %4020 }
 0xd2e   :  { %v4023_v9 = vunpack.i.h.bf16 %v4021_v8  ;;  %v4022_v10 = vunpack.i.l.bf16 %v4021_v8  ;;  %3882 = vmatprep.subr.msk.bf16.mxu1 %vm4605_vm2, %v3880_v1 }
 0xd2f   :  { %3885 = vmatpush3.bf16.xpose.msk.msra.mxu1 %vm4605_vm2, %v3880_v1 }
 0xd30   :  { %v3886_v11 = vpack.c.bf16 %v4023_v9, %v4022_v10 }
 0xd31   :  { %v2057_v12 = vpop.permute.xlu1 %2056 }
 0xd32   :  { %3888 = vmatprep.subr.msk.bf16.mxu1 %vm4605_vm2, %v3886_v11 }
 0xd33   :  { %3541 = vmatmul.mubr.msk.f32.vlgmr.msra.gmra.mrb[32].mxu0 %vm569_vm1, %v1778_v58 }
 0xd34   :  { %3543 = vmatprep.mubr.msk.f32.mxu0 %vm569_vm1, %v1779_v55 }
 0xd35   :  { %v2061_v14 = vpop.permute.xlu1 %2060 }
 0xd37   :  { %3544 = vmatmul.mubr.msk.f32.gmra.mrb[34].mxu0 %vm569_vm1, %v1780_v59  ;;  %3891 = vmatpush3.bf16.xpose.msk.msra.mxu1 %vm4605_vm2, %v3886_v11 }
 0xd3e   :  { %3569 = vmatmul.mubr.msk.f32.vlgmr.msra.gmra.mrb[24].mxu1 %vm569_vm1, %v2057_v12 }
 0xd3f   :  { %3571 = vmatprep.mubr.msk.f32.mxu1 %vm569_vm1, %v2059_v13 }
 0xd42   :  { %3572 = vmatmul.mubr.msk.f32.gmra.mrb[26].mxu1 %vm569_vm1, %v2061_v14 }
 0xe06   :  { %v3542_v15 = vpop.f32.mrb[32].mxu0 }
 0xe07   :  { %v1885_v17 = vadd.f32 %v4164_v16, %v3542_v15  ;;  %v1879_v18 = vpop.f32.mrb[33].mxu0 }
 0xe08   :  { %v1880_v19 = vadd.f32 %v4165_v0, %v1879_v18 }
 0xe09   :  { %v1901_v20 = vsel %vm393_vm0, %v1885_v17, -inf }
 0xe0a   :  { %1902 = vmax.xlane.f32.xlu1 %v1901_v20  ;;  %v3545_v21 = vpop.f32.mrb[34].mxu0  ;;  %v1898_v22 = vsel %vm393_vm0, %v1880_v19, -inf }
 0xe0b   :  { %v1895_v24 = vadd.f32 %v4166_v23, %v3545_v21  ;;  %v1889_v25 = vpop.f32.mrb[35].mxu0  ;;  %1899 = vmax.xlane.f32.xlu0 %v1898_v22 }
 0xe0c   :  { %v1890_v27 = vadd.f32 %v1889_v25, %v4646_v30  ;;  %v4167_v30 = vld [vmem:[%s5146_s2 + $0x30] sm:$0xff] }
 0xe0d   :  { %v1907_v26 = vsel %vm393_vm0, %v1895_v24, -inf }
 0xe0e   :  { %v1904_v34 = vsel %vm393_vm0, %v1890_v27, -inf }
 0xe0f   :  { %1908 = vmax.xlane.f32.xlu0 %v1907_v26 }
 0xe11   :  { %v3570_v28 = vpop.f32.mrb[24].mxu1 }
 0xe12   :  { %v2158_v29 = vadd.f32 %v4164_v16, %v3570_v28  ;;  %v2152_v33 = vpop.f32.mrb[25].mxu1 }
 0xe13   :  { %v2153_v35 = vadd.f32 %v4165_v0, %v2152_v33  ;;  %1905 = vmax.xlane.f32.xlu0 %v1904_v34 }
 0xe14   :  { %v2174_v36 = vsel %vm393_vm0, %v2158_v29, -inf }
 0xe15   :  { %v3573_v37 = vpop.f32.mrb[26].mxu1  ;;  %2175 = vmax.xlane.f32.xlu1 %v2174_v36  ;;  %v2171_v49 = vsel %vm393_vm0, %v2153_v35, -inf }
 0xe16   :  { %v2168_v39 = vadd.f32 %v4166_v23, %v3573_v37  ;;  %v2162_v40 = vpop.f32.mrb[27].mxu1 }
 0xe17   :  { %v2163_v54 = vadd.f32 %v4167_v30, %v2162_v40  ;;  %2172 = vmax.xlane.f32.xlu0 %v2171_v49 }
 0xe18   :  { %v2180_v48 = vsel %vm393_vm0, %v2168_v39, -inf }
 0xe19   :  { %2181 = vmax.xlane.f32.xlu1 %v2180_v48  ;;  %v2177_v56 = vsel %vm393_vm0, %v2163_v54, -inf }
 0xe1b   :  { %2178 = vmax.xlane.f32.xlu0 %v2177_v56 }
 0xe97   :  { %v1903_v41 = vpop.xlane.xlu1 %1902 }
 0xe98   :  { %v1911_v43 = vsub.f32 %v1885_v17, %v1903_v41  ;;  %v1900_v45 = vpop.xlane.xlu0 %1899 }
 0xe99   :  { %v1910_v46 = vsub.f32 %v1880_v19, %v1900_v45 }
 0xe9a   :  { %v1916_v47 = vmul.f32 1.442695, %v1911_v43 }
 0xe9b   :  { %v1914_v31 = vmul.f32 1.442695, %v1910_v46 }
 0xe9c   :  { %4108 = vpow2.f32 %v1916_v47  ;;  %v1909_v52 = vpop.xlane.xlu0 %1908 }
 0xe9d   :  { %4110 = vpow2.f32 %v1914_v31  ;;  %v1913_v55 = vsub.f32 %v1895_v24, %v1909_v52 }
 0xe9f   :  { %v1920_v38 = vmul.f32 1.442695, %v1913_v55 }
 0xea0   :  { %v1906_v58 = vpop.xlane.xlu0 %1905 }
 0xea1   :  { %v1912_v59 = vsub.f32 %v1890_v27, %v1906_v58 }
 0xea2   :  { %v2176_v60 = vpop.xlane.xlu1 %2175 }
 0xea3   :  { %v2184_v51 = vsub.f32 %v2158_v29, %v2176_v60  ;;  %v1918_v3 = vmul.f32 1.442695, %v1912_v59 }
 0xea4   :  { %v2173_v61 = vpop.xlane.xlu0 %2172 }
 0xea5   :  { %v2189_v62 = vmul.f32 1.442695, %v2184_v51  ;;  %v2183_v63 = vsub.f32 %v2153_v35, %v2173_v61 }
 0xea6   :  { %v4937_v2 = vpop.eup %4108  ;;  %v2182_v4 = vpop.xlane.xlu1 %2181 }
 0xea7   :  { %v4111_v5 = vpop.eup %4110  ;;  %4112 = vpow2.f32 %v2189_v62  ;;  %v2187_v6 = vmul.f32 1.442695, %v2183_v63  ;;  %v2186_v7 = vsub.f32 %v2168_v39, %v2182_v4  ;;  %v1925_v1 = vsel %vm393_vm0, %v4937_v2, 0.0 }
 0xea8   :  { %4114 = vpow2.f32 %v1920_v38  ;;  %1926 = vadd.xlane.f32.xlu1 %v1925_v1  ;;  %v2179_v8 = vpop.xlane.xlu0 %2178  ;;  %v1922_v9 = vsel %vm393_vm0, %v4111_v5, 0.0 }
 0xea9   :  { %4116 = vpow2.f32 %v2187_v6  ;;  %v2193_v10 = vmul.f32 1.442695, %v2186_v7  ;;  %v2185_v11 = vsub.f32 %v2163_v54, %v2179_v8  ;;  %1923 = vadd.xlane.f32.xlu0 %v1922_v9  ;;  %v3031_v6 = vld [vmem:[%s5149_s5 + $0x30] sm:$0xff]  ;;  %v3032_v7 = vld [vmem:[%s5149_s5 + $0x38] sm:$0xff]  ;;  %v3017_v8 = vld [vmem:[%s5149_s5 + $0x20] sm:$0xff] }
 0xeaa   :  { %4118 = vpow2.f32 %v1918_v3  ;;  %v3900_v1 = vpack.c.bf16 %v3032_v7, %v3031_v6  ;;  %v3018_v9 = vld [vmem:[%s5149_s5 + $0x28] sm:$0xff] }
 0xeab   :  { %v2191_v12 = vmul.f32 1.442695, %v2185_v11  ;;  %4120 = vpow2.f32 %v2193_v10  ;;  %v3904_v10 = vpack.c.bf16 %v3018_v9, %v3017_v8 }
 0xead   :  { %4122 = vpow2.f32 %v2191_v12 }
 0xeb1   :  { %v4942_v13 = vpop.eup %4112 }
 0xeb2   :  { %v4944_v14 = vpop.eup %4114  ;;  %v2198_v15 = vsel %vm393_vm0, %v4942_v13, 0.0 }
 0xeb3   :  { %v4948_v16 = vpop.eup %4116  ;;  %2199 = vadd.xlane.f32.xlu1 %v2198_v15  ;;  %v1931_v0 = vsel %vm393_vm0, %v4944_v14, 0.0 }
 0xeb4   :  { %v2195_v17 = vsel %vm393_vm0, %v4948_v16, 0.0  ;;  %v4119_v18 = vpop.eup %4118 }
 0xeb5   :  { %2196 = vadd.xlane.f32.xlu0 %v2195_v17  ;;  %v4954_v19 = vpop.eup %4120  ;;  %v1928_v20 = vsel %vm393_vm0, %v4119_v18, 0.0 }
 0xeb6   :  { %v2204_v22 = vsel %vm393_vm0, %v4954_v19, 0.0 }
 0xeb7   :  { %1932 = vadd.xlane.f32.xlu1 %v1931_v0  ;;  %v4957_v21 = vpop.eup %4122 }
 0xeb8   :  { %v2201_v23 = vsel %vm393_vm0, %v4957_v21, 0.0 }
 0xeb9   :  { %1929 = vadd.xlane.f32.xlu0 %v1928_v20 }
 0xebb   :  { %2205 = vadd.xlane.f32.xlu1 %v2204_v22 }
 0xebd   :  { %2202 = vadd.xlane.f32.xlu0 %v2201_v23 }
 0xecc   :  { %4030 = vrot.lane.b32.xlu1 %v4882_v53, %s4183_s10 }
 0xed0   :  { %4035 = vrot.lane.b32.xlu1 %v4876_v44, %s4184_s11 }
 0xed3   :  { %4025 = vrot.lane.b32.xlu0 %v4876_v44, %s4183_s10 }
 0xed4   :  { %4040 = vrot.lane.b32.xlu1 %v4882_v53, %s4184_s11 }
 0xf35   :  { %v1927_v25 = vpop.xlane.xlu1 %1926 }
 0xf36   :  { %v1924_v24 = vpop.xlane.xlu0 %1923 }
 0xf37   :  { %4124 = vrcp.f32 %v1924_v24 }
 0xf38   :  { %4126 = vrcp.f32 %v1927_v25 }
 0xf40   :  { %v2200_v26 = vpop.xlane.xlu1 %2199 }
 0xf41   :  { %v4125_v27 = vpop.eup %4124 }
 0xf42   :  { %v2197_v28 = vpop.xlane.xlu0 %2196  ;;  %v1935_v29 = vmul.f32 %v4125_v27, %v4111_v5  ;;  %v4127_v45 = vpop.eup %4126 }
 0xf43   :  { %v1937_v55 = vmul.f32 %v4127_v45, %v4937_v2 }
 0xf44   :  { %v1933_v33 = vpop.xlane.xlu1 %1932  ;;  %3554 = vmatprep.mubr.msk.f32.mxu0 %vm393_vm0, %v1935_v29 }
 0xf46   :  { %v1930_v34 = vpop.xlane.xlu0 %1929 }
 0xf47   :  { %4128 = vrcp.f32 %v1930_v34 }
 0xf48   :  { %v2206_v35 = vpop.xlane.xlu1 %2205  ;;  %4130 = vrcp.f32 %v1933_v33 }
 0xf49   :  { %4132 = vrcp.f32 %v2197_v28 }
 0xf4a   :  { %v2203_v36 = vpop.xlane.xlu0 %2202  ;;  %4134 = vrcp.f32 %v2200_v26 }
 0xf4b   :  { %4136 = vrcp.f32 %v2203_v36 }
 0xf4c   :  { %v4031_v37 = vpop.permute.xlu1 %4030  ;;  %4138 = vrcp.f32 %v2206_v35 }
 0xf4d   :  { %v4033_v49 = vunpack.i.h.bf16 %v4031_v37  ;;  %v4032_v39 = vunpack.i.l.bf16 %v4031_v37 }
 0xf4e   :  { %v4026_v44 = vpop.permute.xlu0 %4025 }
 0xf4f   :  { %v4028_v53 = vunpack.i.h.bf16 %v4026_v44  ;;  %v4027_v40 = vunpack.i.l.bf16 %v4026_v44  ;;  %v3876_v48 = vpack.c.bf16 %v4033_v49, %v4032_v39 }
 0xf50   :  { %v4036_v30 = vpop.permute.xlu1 %4035 }
 0xf51   :  { %v3872_v54 = vpack.c.bf16 %v4028_v53, %v4027_v40  ;;  %v4038_v56 = vunpack.i.h.bf16 %v4036_v30  ;;  %v4037_v41 = vunpack.i.l.bf16 %v4036_v30  ;;  %v4129_v46 = vpop.eup %4128 }
 0xf52   :  { %v4131_v58 = vpop.eup %4130  ;;  %v1939_v59 = vmul.f32 %v4129_v46, %v4119_v18 }
 0xf53   :  { %3873 = vmatprep.subr.bf16.mxu0 %v3872_v54  ;;  %v3892_v47 = vpack.c.bf16 %v4038_v56, %v4037_v41  ;;  %v4133_v60 = vpop.eup %4132  ;;  %v1941_v38 = vmul.f32 %v4131_v58, %v4944_v14  ;;  %v3043_v58 = vld [vmem:[%s5150_s6 + $0x28] sm:$0xff] }
 0xf54   :  { %v4041_v43 = vpop.permute.xlu1 %4040  ;;  %3875 = vmatpush3.bf16.msra.mxu0 %v3872_v54  ;;  %v4135_v61 = vpop.eup %4134  ;;  %v2208_v62 = vmul.f32 %v4133_v60, %v4948_v16  ;;  %v3044_v60 = vld [vmem:[%s5150_s6 + $0x30] sm:$0xff] }
 0xf55   :  { %3877 = vmatprep.subr.bf16.mxu0 %v3876_v48  ;;  %v4043_v31 = vunpack.i.h.bf16 %v4041_v43  ;;  %v4042_v52 = vunpack.i.l.bf16 %v4041_v43  ;;  %v4137_v63 = vpop.eup %4136  ;;  %v2210_v2 = vmul.f32 %v4135_v61, %v4942_v13 }
 0xf56   :  { %v4139_v3 = vpop.eup %4138  ;;  %v2212_v4 = vmul.f32 %v4137_v63, %v4957_v21 }
 0xf57   :  { %v3896_v51 = vpack.c.bf16 %v4043_v31, %v4042_v52  ;;  %v2214_v5 = vmul.f32 %v4139_v3, %v4954_v19  ;;  %v3041_v19 = vld [vmem:[%s5147_s3 + $0x3] ss:$0 sm:$0xff] }
 0xf58   :  { %3879 = vmatpush3.bf16.msra.mxu0 %v3876_v48 }
 0xf59   :  { %3893 = vmatprep.subr.bf16.mxu0 %v3892_v47 }
 0xf5b   :  { %3555 = vmatmul.mubr.msk.f32.vlgmr.msra.gmra.mrb[36].mxu0 %vm393_vm0, %v1937_v55  ;;  %v3042_v55 = vld [vmem:[%s5150_s6 + $0x20] sm:$0xff] }
 0xf5c   :  { %3557 = vmatprep.mubr.msk.f32.mxu0 %vm393_vm0, %v1939_v59  ;;  %3895 = vmatpush3.bf16.msra.mxu0 %v3892_v47  ;;  %v3908_v59 = vpack.c.bf16 %v3043_v58, %v3042_v55 }
 0xf5d   :  { %3897 = vmatprep.subr.bf16.mxu0 %v3896_v51 }
 0xf5e   :  { %3909 = vmatprep.subr.bf16.mxu1 %v3908_v59 }
 0xf5f   :  { %3558 = vmatmul.mubr.msk.f32.gmra.mrb[38].mxu0 %vm393_vm0, %v1941_v38  ;;  %3911 = vmatpush3.bf16.msra.mxu1 %v3908_v59 }
 0xf60   :  { %3899 = vmatpush3.bf16.msra.mxu0 %v3896_v51  ;;  %3582 = vmatprep.mubr.msk.f32.mxu0 %vm393_vm0, %v2208_v62  ;;  %v3045_v51 = vld [vmem:[%s5150_s6 + $0x38] sm:$0xff] }
 0xf61   :  { %3901 = vmatprep.subr.bf16.mxu0 %v3900_v1  ;;  %v3912_v38 = vpack.c.bf16 %v3045_v51, %v3044_v60 }
 0xf63   :  { %3583 = vmatmul.mubr.msk.f32.vlgmr.msra.gmra.mrb[40].mxu0 %vm393_vm0, %v2210_v2  ;;  %3913 = vmatprep.subr.bf16.mxu1 %v3912_v38 }
 0xf64   :  { %3585 = vmatprep.mubr.msk.f32.mxu0 %vm393_vm0, %v2212_v4  ;;  %3903 = vmatpush3.bf16.msra.mxu0 %v3900_v1 }
 0xf65   :  { %3905 = vmatprep.subr.bf16.mxu0 %v3904_v10  ;;  %3915 = vmatpush3.bf16.msra.mxu1 %v3912_v38 }
 0xf67   :  { %3586 = vmatmul.mubr.msk.f32.gmra.mrb[42].mxu0 %vm393_vm0, %v2214_v5 }
0x102e   :  { %v3556_v11 = vpop.f32.mrb[36].mxu0 }
0x102f   :  { %v2032_v12 = vpop.f32.mrb[37].mxu0 }
0x1032   :  { %v3559_v13 = vpop.f32.mrb[38].mxu0 }
0x1033   :  { %v2042_v14 = vpop.f32.mrb[39].mxu0 }
0x1036   :  { %v3584_v15 = vpop.f32.mrb[40].mxu0 }
0x1037   :  { %v2305_v16 = vpop.f32.mrb[41].mxu0 }
0x1038   :  { %3592 = vmatprep.mubr.msk.f32.mxu0 %vm569_vm1, %v2305_v16 }
0x1039   :  { %3593 = vmatmul.mubr.msk.f32.vlgmr.msra.gmra.mrb[44].mxu0 %vm569_vm1, %v3584_v15 }
0x103a   :  { %v3587_v17 = vpop.f32.mrb[42].mxu0  ;;  %3907 = vmatpush3.bf16.msra.mxu0 %v3904_v10 }
0x103b   :  { %v2315_v18 = vpop.f32.mrb[43].mxu0 }
0x103c   :  { %3595 = vmatprep.mubr.msk.f32.mxu0 %vm569_vm1, %v2315_v18  ;;  %v3051_v18 = vld [vmem:[%s5151_s7 + $0x80] sm:$0xff] }
0x103d   :  { %3596 = vmatmul.mubr.msk.f32.gmra.mrb[46].mxu0 %vm569_vm1, %v3587_v17 }
0x103e   :  { %3602 = vmatprep.mubr.msk.f32.mxu0 %vm569_vm1, %v2032_v12 }
0x1041   :  { %3603 = vmatmul.mubr.msk.f32.vlgmr.msra.gmra.mrb[44].mxu0 %vm569_vm1, %v3556_v11 }
0x1042   :  { %3605 = vmatprep.mubr.msk.f32.mxu0 %vm569_vm1, %v2042_v14 }
0x1045   :  { %3606 = vmatmul.mubr.msk.f32.gmra.mrb[46].mxu0 %vm569_vm1, %v3559_v13 }
0x1114   :  { %v3604_v0 = vpop.f32.mrb[44].mxu0 }
0x1115   :  { %v2522_v20 = vadd.f32 %v3604_v0, %v4831_v42  ;;  %v2502_v21 = vpop.f32.mrb[45].mxu0  ;;  %v3052_v0 = vld [vmem:[%s5151_s7 + $0x88] sm:$0xff] }
0x1116   :  { %v2521_v22 = vadd.f32 %v2502_v21, %v4833_v57  ;;  %v3054_v21 = vld [vmem:[%s5151_s7 + $0x98] sm:$0xff] }
0x1117   :  { %v5010_v23 = vadd.f32 %v3041_v19, %v2522_v20  ;;  %v3053_v20 = vld [vmem:[%s5151_s7 + $0x90] sm:$0xff] }
0x1118   :  { %v5012_v24 = vadd.f32 %v3041_v19, %v2521_v22  ;;  %v3607_v25 = vpop.f32.mrb[46].mxu0  ;;  %v3920_v22 = vpack.c.bf16 %v3054_v21, %v3053_v20 }
0x1119   :  { %v2512_v26 = vpop.f32.mrb[47].mxu0  ;;  %v2537_v27 = vsel %vm393_vm0, %v5010_v23, 0.0  ;;  %v2524_v28 = vadd.f32 %v3607_v25, %v4841_v50  ;;  %v3055_v25 = vld [vmem:[%s5151_s7 + $0xa0] sm:$0xff] }
0x111a   :  { %v2523_v29 = vadd.f32 %v2512_v26, %v4843_v32  ;;  %2538 = vadd.xlane.f32.xlu1 %v2537_v27  ;;  %v2534_v42 = vsel %vm393_vm0, %v5012_v24, 0.0  ;;  %v3056_v26 = vld [vmem:[%s5151_s7 + $0xa8] sm:$0xff] }
0x111b   :  { %2535 = vadd.xlane.f32.xlu0 %v2534_v42  ;;  %v5022_v57 = vadd.f32 %v3041_v19, %v2524_v28  ;;  %v3924_v27 = vpack.c.bf16 %v3056_v26, %v3055_v25  ;;  %v3057_v28 = vld [vmem:[%s5151_s7 + $0xb0] sm:$0xff] }
0x111c   :  { %v5020_v33 = vadd.f32 %v3041_v19, %v2523_v29  ;;  %v3916_v19 = vpack.c.bf16 %v3052_v0, %v3051_v18  ;;  %v3058_v29 = vld [vmem:[%s5151_s7 + $0xb8] sm:$0xff] }
0x111d   :  { %v2543_v35 = vsel %vm393_vm0, %v5022_v57, 0.0  ;;  %v3928_v42 = vpack.c.bf16 %v3058_v29, %v3057_v28  ;;  %v3067_v29 = vld [vmem:[%s5147_s3 + $0x7] ss:$0 sm:$0xff] }
0x111e   :  { %v2540_v34 = vsel %vm393_vm0, %v5020_v33, 0.0  ;;  %3917 = vmatprep.subr.bf16.mxu1 %v3916_v19 }
0x111f   :  { %2541 = vadd.xlane.f32.xlu0 %v2540_v34  ;;  %v3059_v34 = vld [vmem:[%s5151_s7 + $0xc0] sm:$0xff] }
0x1123   :  { %2544 = vadd.xlane.f32.xlu0 %v2543_v35  ;;  %v3060_v35 = vld [vmem:[%s5151_s7 + $0xc8] sm:$0xff] }
0x11a7   :  { %v2539_v50 = vpop.xlane.xlu1 %2538 }
0x11a8   :  { %v2547_v36 = vmul.f32 0.03125, %v2539_v50  ;;  %v2536_v32 = vpop.xlane.xlu0 %2535  ;;  %v3932_v50 = vpack.c.bf16 %v3060_v35, %v3059_v34 }
0x11a9   :  { %v2546_v37 = vmul.f32 0.03125, %v2536_v32  ;;  %v3062_v32 = vld [vmem:[%s5151_s7 + $0xd8] sm:$0xff] }
0x11aa   :  { %v2551_v44 = vsub.f32 %v5010_v23, %v2547_v36  ;;  %v3061_v36 = vld [vmem:[%s5151_s7 + $0xd0] sm:$0xff] }
0x11ab   :  { %v2550_v49 = vsub.f32 %v5012_v24, %v2546_v37  ;;  %v3936_v37 = vpack.c.bf16 %v3062_v32, %v3061_v36 }
0x11ac   :  { %v2542_v39 = vpop.xlane.xlu0 %2541  ;;  %v2555_v53 = vmul.f32 %v2551_v44, %v2551_v44 }
0x11ad   :  { %v2548_v40 = vmul.f32 0.03125, %v2542_v39  ;;  %v2554_v30 = vmul.f32 %v2550_v49, %v2550_v49 }
0x11ae   :  { %v2561_v54 = vsel %vm393_vm0, %v2555_v53, 0.0  ;;  %v3065_v53 = vld [vmem:[%s5151_s7 + $0xf0] sm:$0xff] }
0x11af   :  { %v2552_v48 = vsub.f32 %v5020_v33, %v2548_v40  ;;  %2562 = vadd.xlane.f32.xlu1 %v2561_v54  ;;  %v2558_v56 = vsel %vm393_vm0, %v2554_v30, 0.0  ;;  %v3066_v40 = vld [vmem:[%s5151_s7 + $0xf8] sm:$0xff]  ;;  %v3046_v54 = vld [vmem:[%s5147_s3 + $0x5] ss:$0 sm:$0xff] }
0x11b0   :  { %2559 = vadd.xlane.f32.xlu0 %v2558_v56  ;;  %v2545_v41 = vpop.xlane.xlu0 %2544  ;;  %v3944_v30 = vpack.c.bf16 %v3066_v40, %v3065_v53 }
0x11b1   :  { %v2549_v43 = vmul.f32 0.03125, %v2545_v41  ;;  %v2556_v45 = vmul.f32 %v2552_v48, %v2552_v48 }
0x11b3   :  { %v2553_v46 = vsub.f32 %v5022_v57, %v2549_v43  ;;  %v2564_v47 = vsel %vm393_vm0, %v2556_v45, 0.0 }
0x11b4   :  { %2565 = vadd.xlane.f32.xlu0 %v2564_v47 }
0x11b5   :  { %v2557_v31 = vmul.f32 %v2553_v46, %v2553_v46 }
0x11b7   :  { %v2567_v52 = vsel %vm393_vm0, %v2557_v31, 0.0 }
0x11b8   :  { %2568 = vadd.xlane.f32.xlu1 %v2567_v52 }
0x123c   :  { %v2563_v61 = vpop.xlane.xlu1 %2562 }
0x123d   :  { %v2571_v62 = vmul.f32 0.03125, %v2563_v61  ;;  %v2560_v63 = vpop.xlane.xlu0 %2559 }
0x123e   :  { %v2570_v2 = vmul.f32 0.03125, %v2560_v63 }
0x123f   :  { %v2575_v3 = vadd.f32 1e-06, %v2571_v62 }
0x1240   :  { %v2574_v4 = vadd.f32 1e-06, %v2570_v2 }
0x1241   :  { %4140 = vrsqrt.f32 %v2575_v3  ;;  %v2566_v5 = vpop.xlane.xlu0 %2565 }
0x1242   :  { %4142 = vrsqrt.f32 %v2574_v4  ;;  %v2572_v6 = vmul.f32 0.03125, %v2566_v5 }
0x1244   :  { %v2576_v7 = vadd.f32 1e-06, %v2572_v6 }
0x1245   :  { %v2569_v1 = vpop.xlane.xlu1 %2568 }
0x1246   :  { %4144 = vrsqrt.f32 %v2576_v7  ;;  %v2573_v8 = vmul.f32 0.03125, %v2569_v1 }
0x1248   :  { %v2577_v9 = vadd.f32 1e-06, %v2573_v8 }
0x124a   :  { %4146 = vrsqrt.f32 %v2577_v9 }
0x124b   :  { %v4141_v10 = vpop.eup %4140 }
0x124c   :  { %v4143_v11 = vpop.eup %4142  ;;  %v2583_v13 = vmul.f32 %v4141_v10, %v2551_v44  ;;  %v3063_v44 = vld [vmem:[%s5151_s7 + $0xe0] sm:$0xff] }
0x124d   :  { %v2582_v12 = vmul.f32 %v4143_v11, %v2550_v49  ;;  %v3064_v49 = vld [vmem:[%s5151_s7 + $0xe8] sm:$0xff] }
0x124e   :  { %v3940_v39 = vpack.c.bf16 %v3064_v49, %v3063_v44 }
0x124f   :  { %3616 = vmatprep.mubr.msk.f32.mxu1 %vm393_vm0, %v2582_v12 }
0x1250   :  { %v4145_v14 = vpop.eup %4144  ;;  %3617 = vmatmul.mubr.msk.f32.vlgmr.msra.gmra.mrb[28].mxu1 %vm393_vm0, %v2583_v13 }
0x1251   :  { %v2584_v15 = vmul.f32 %v4145_v14, %v2552_v48  ;;  %3919 = vmatpush3.bf16.msra.mxu1 %v3916_v19 }
0x1252   :  { %3921 = vmatprep.subr.bf16.mxu1 %v3920_v22 }
0x1253   :  { %3619 = vmatprep.mubr.msk.f32.mxu1 %vm393_vm0, %v2584_v15 }
0x1254   :  { %v4147_v16 = vpop.eup %4146 }
0x1255   :  { %v2585_v17 = vmul.f32 %v4147_v16, %v2553_v46  ;;  %3923 = vmatpush3.bf16.msra.mxu1 %v3920_v22 }
0x1256   :  { %3925 = vmatprep.subr.bf16.mxu1 %v3924_v27 }
0x1257   :  { %3620 = vmatmul.mubr.msk.f32.gmra.mrb[30].mxu1 %vm393_vm0, %v2585_v17 }
0x1259   :  { %3927 = vmatpush3.bf16.msra.mxu1 %v3924_v27 }
0x125a   :  { %3929 = vmatprep.subr.bf16.mxu1 %v3928_v42 }
0x125d   :  { %3931 = vmatpush3.bf16.msra.mxu1 %v3928_v42 }
0x125e   :  { %3933 = vmatprep.subr.bf16.mxu1 %v3932_v50 }
0x1261   :  { %3935 = vmatpush3.bf16.msra.mxu1 %v3932_v50 }
0x1262   :  { %3937 = vmatprep.subr.bf16.mxu1 %v3936_v37 }
0x1265   :  { %3939 = vmatpush3.bf16.msra.mxu1 %v3936_v37 }
0x1266   :  { %3941 = vmatprep.subr.bf16.mxu1 %v3940_v39 }
0x1269   :  { %3943 = vmatpush3.bf16.msra.mxu1 %v3940_v39 }
0x126a   :  { %3945 = vmatprep.subr.bf16.mxu1 %v3944_v30 }
0x126d   :  { %3947 = vmatpush3.bf16.msra.mxu1 %v3944_v30 }
0x1323   :  { %v3618_v48 = vpop.f32.mrb[28].mxu1 }
0x1324   :  { %v2680_v56 = vadd.f32 %v3618_v48, %v3046_v54  ;;  %v2674_v41 = vpop.f32.mrb[29].mxu1 }
0x1325   :  { %v2675_v43 = vadd.f32 %v3046_v54, %v2674_v41 }
0x1326   :  { %v2694_v45 = vmul.f32 %v2680_v56, %v2680_v56 }
0x1327   :  { %v2693_v46 = vmul.f32 %v2675_v43, %v2675_v43 }
0x1328   :  { %v2698_v47 = vmul.f32 %v2694_v45, %v2680_v56 }
0x1329   :  { %v2697_v31 = vmul.f32 %v2693_v46, %v2675_v43 }
0x132a   :  { %v2702_v52 = vmul.f32 0.044715, %v2698_v47  ;;  %v3621_v55 = vpop.f32.mrb[30].mxu1 }
0x132b   :  { %v2701_v58 = vmul.f32 0.044715, %v2697_v31  ;;  %v2690_v59 = vadd.f32 %v3621_v55, %v3046_v54  ;;  %v2684_v60 = vpop.f32.mrb[31].mxu1 }
0x132c   :  { %v2706_v51 = vadd.f32 %v2702_v52, %v2680_v56  ;;  %v2685_v38 = vadd.f32 %v3046_v54, %v2684_v60 }
0x132d   :  { %v2705_v61 = vadd.f32 %v2701_v58, %v2675_v43  ;;  %v2696_v62 = vmul.f32 %v2690_v59, %v2690_v59 }
0x132e   :  { %v2710_v63 = vmul.f32 0.7978846, %v2706_v51  ;;  %v2695_v2 = vmul.f32 %v2685_v38, %v2685_v38 }
0x132f   :  { %v2709_v3 = vmul.f32 0.7978846, %v2705_v61  ;;  %v2700_v4 = vmul.f32 %v2696_v62, %v2690_v59 }
0x1330   :  { %4148 = vtanh.f32 %v2710_v63  ;;  %v2699_v5 = vmul.f32 %v2695_v2, %v2685_v38 }
0x1331   :  { %v2704_v6 = vmul.f32 0.044715, %v2700_v4  ;;  %4150 = vtanh.f32 %v2709_v3 }
0x1332   :  { %v2703_v7 = vmul.f32 0.044715, %v2699_v5 }
0x1333   :  { %v2708_v1 = vadd.f32 %v2704_v6, %v2690_v59 }
0x1334   :  { %v2707_v8 = vadd.f32 %v2703_v7, %v2685_v38 }
0x1335   :  { %v2712_v9 = vmul.f32 0.7978846, %v2708_v1 }
0x1336   :  { %v2711_v10 = vmul.f32 0.7978846, %v2707_v8 }
0x1337   :  { %4152 = vtanh.f32 %v2712_v9 }
0x1338   :  { %4154 = vtanh.f32 %v2711_v10 }
0x133a   :  { %v4149_v11 = vpop.eup %4148 }
0x133b   :  { %v4151_v12 = vpop.eup %4150  ;;  %v2718_v13 = vadd.f32 1.0, %v4149_v11 }
0x133c   :  { %v2717_v14 = vadd.f32 1.0, %v4151_v12 }
0x133d   :  { %v2722_v15 = vmul.f32 0.5, %v2718_v13 }
0x133e   :  { %v2721_v16 = vmul.f32 0.5, %v2717_v14 }
0x133f   :  { %v2726_v0 = vmul.f32 %v2722_v15, %v2680_v56 }
0x1340   :  { %v2725_v17 = vmul.f32 %v2721_v16, %v2675_v43  ;;  %v3068_v16 = vld [vmem:[%s5147_s3 + $0x8] ss:$0 sm:$0xff] }
0x1341   :  { %v4153_v18 = vpop.eup %4152 }
0x1342   :  { %v4155_v19 = vpop.eup %4154  ;;  %3654 = vmatprep.mubr.f32.mxu1 %v2725_v17  ;;  %v2720_v20 = vadd.f32 1.0, %v4153_v18 }
0x1343   :  { %3655 = vmatmul.mubr.f32.vlgmr.msra.gmra.mrb[32].mxu1 %v2726_v0  ;;  %v2719_v21 = vadd.f32 1.0, %v4155_v19 }
0x1344   :  { %v2724_v22 = vmul.f32 0.5, %v2720_v20 }
0x1345   :  { %v2723_v25 = vmul.f32 0.5, %v2719_v21 }
0x1346   :  { %v2728_v27 = vmul.f32 %v2724_v22, %v2690_v59  ;;  %v3069_v22 = vld [vmem:[%s5147_s3 + $0x9] ss:$0 sm:$0xff] }
0x1347   :  { %v2727_v26 = vmul.f32 %v2723_v25, %v2685_v38 }
0x1349   :  { %3657 = vmatprep.mubr.f32.mxu1 %v2727_v26 }
0x134a   :  { %3658 = vmatmul.mubr.f32.gmra.mrb[34].mxu1 %v2728_v27 }
0x1416   :  { %v3656_v28 = vpop.f32.mrb[32].mxu1 }
0x1417   :  { %v2832_v42 = vadd.f32 %v3656_v28, %v5010_v23  ;;  %v2812_v34 = vpop.f32.mrb[33].mxu1 }
0x1418   :  { %v2831_v35 = vadd.f32 %v2812_v34, %v5012_v24  ;;  %v2915_v34 = vld [vmem:[%s5146_s2 + $0x48] sm:$0xff] }
0x1419   :  { %v2841_v50 = vadd.f32 %v3067_v29, %v2832_v42 }
0x141a   :  { %v2840_v36 = vadd.f32 %v3067_v29, %v2831_v35  ;;  %v2914_v35 = vld [vmem:[%s5146_s2 + $0x40] sm:$0xff] }
0x141b   :  { %v2847_v32 = vsel %vm393_vm0, %v2841_v50, 0.0 }
0x141c   :  { %2848 = vadd.xlane.f32.xlu1 %v2847_v32  ;;  %v2844_v37 = vsel %vm393_vm0, %v2840_v36, 0.0 }
0x141d   :  { %2845 = vadd.xlane.f32.xlu0 %v2844_v37  ;;  %v3659_v44 = vpop.f32.mrb[34].mxu1 }
0x141e   :  { %v2834_v49 = vadd.f32 %v3659_v44, %v5022_v57  ;;  %v2822_v39 = vpop.f32.mrb[35].mxu1 }
0x141f   :  { %v2833_v53 = vadd.f32 %v2822_v39, %v5020_v33 }
0x1420   :  { %v2843_v40 = vadd.f32 %v3067_v29, %v2834_v49 }
0x1421   :  { %v2842_v30 = vadd.f32 %v3067_v29, %v2833_v53 }
0x1422   :  { %v2853_v23 = vsel %vm393_vm0, %v2843_v40, 0.0 }
0x1423   :  { %2854 = vadd.xlane.f32.xlu1 %v2853_v23  ;;  %v2850_v24 = vsel %vm393_vm0, %v2842_v30, 0.0 }
0x1424   :  { %2851 = vadd.xlane.f32.xlu0 %v2850_v24 }
0x14a9   :  { %v2849_v54 = vpop.xlane.xlu1 %2848 }
0x14aa   :  { %v2857_v48 = vmul.f32 0.03125, %v2849_v54  ;;  %v2846_v56 = vpop.xlane.xlu0 %2845 }
0x14ab   :  { %v2856_v41 = vmul.f32 0.03125, %v2846_v56 }
0x14ac   :  { %v2861_v43 = vsub.f32 %v2841_v50, %v2857_v48 }
0x14ad   :  { %v2860_v45 = vsub.f32 %v2840_v36, %v2856_v41 }
0x14ae   :  { %v2865_v46 = vmul.f32 %v2861_v43, %v2861_v43 }
0x14af   :  { %v2864_v47 = vmul.f32 %v2860_v45, %v2860_v45 }
0x14b0   :  { %v2855_v57 = vpop.xlane.xlu1 %2854  ;;  %v2871_v31 = vsel %vm393_vm0, %v2865_v46, 0.0 }
0x14b1   :  { %v2859_v33 = vmul.f32 0.03125, %v2855_v57  ;;  %2872 = vadd.xlane.f32.xlu1 %v2871_v31  ;;  %v2852_v52 = vpop.xlane.xlu0 %2851  ;;  %v2868_v55 = vsel %vm393_vm0, %v2864_v47, 0.0 }
0x14b2   :  { %v2858_v58 = vmul.f32 0.03125, %v2852_v52  ;;  %2869 = vadd.xlane.f32.xlu0 %v2868_v55 }
0x14b3   :  { %v2863_v59 = vsub.f32 %v2843_v40, %v2859_v33 }
0x14b4   :  { %v2862_v60 = vsub.f32 %v2842_v30, %v2858_v58 }
0x14b5   :  { %v2867_v51 = vmul.f32 %v2863_v59, %v2863_v59 }
0x14b6   :  { %v2866_v38 = vmul.f32 %v2862_v60, %v2862_v60 }
0x14b7   :  { %v2877_v61 = vsel %vm393_vm0, %v2867_v51, 0.0 }
0x14b8   :  { %2878 = vadd.xlane.f32.xlu1 %v2877_v61  ;;  %v2874_v62 = vsel %vm393_vm0, %v2866_v38, 0.0 }
0x14b9   :  { %2875 = vadd.xlane.f32.xlu0 %v2874_v62 }
0x153e   :  { %v2873_v63 = vpop.xlane.xlu1 %2872 }
0x153f   :  { %v2881_v2 = vmul.f32 0.03125, %v2873_v63  ;;  %v2870_v3 = vpop.xlane.xlu0 %2869 }
0x1540   :  { %v2880_v4 = vmul.f32 0.03125, %v2870_v3 }
0x1541   :  { %v2885_v5 = vadd.f32 1e-06, %v2881_v2 }
0x1542   :  { %v2884_v6 = vadd.f32 1e-06, %v2880_v4 }
0x1543   :  { %4156 = vrsqrt.f32 %v2885_v5 }
0x1544   :  { %4158 = vrsqrt.f32 %v2884_v6 }
0x1545   :  { %v2879_v7 = vpop.xlane.xlu1 %2878 }
0x1546   :  { %v2883_v1 = vmul.f32 0.03125, %v2879_v7  ;;  %v2876_v8 = vpop.xlane.xlu0 %2875 }
0x1547   :  { %v2882_v9 = vmul.f32 0.03125, %v2876_v8 }
0x1548   :  { %v2887_v10 = vadd.f32 1e-06, %v2883_v1 }
0x1549   :  { %v2886_v11 = vadd.f32 1e-06, %v2882_v9 }
0x154a   :  { %4160 = vrsqrt.f32 %v2887_v10 }
0x154b   :  { %4162 = vrsqrt.f32 %v2886_v11 }
0x154d   :  { %v4157_v12 = vpop.eup %4156 }
0x154e   :  { %v4159_v13 = vpop.eup %4158  ;;  %v2893_v14 = vmul.f32 %v4157_v12, %v2861_v43 }
0x154f   :  { %v2892_v15 = vmul.f32 %v4159_v13, %v2860_v45 }
0x1550   :  { %v2902_v19 = vmul.f32 %v3068_v16, %v2893_v14 }
0x1551   :  { %v2901_v21 = vmul.f32 %v3068_v16, %v2892_v15 }
0x1552   :  { %v2911_v27 = vadd.f32 %v3069_v22, %v2902_v19 }
0x1553   :  { %v2910_v29 = vadd.f32 %v3069_v22, %v2901_v21 }
0x1554   :  { %v4161_v17 = vpop.eup %4160 }
0x1555   :  { %v4163_v18 = vpop.eup %4162  ;;  %v2895_v0 = vmul.f32 %v4161_v17, %v2863_v59 }
0x1556   :  { %v2894_v20 = vmul.f32 %v4163_v18, %v2862_v60 }
0x1557   :  { %v2904_v25 = vmul.f32 %v3068_v16, %v2895_v0 }
0x1558   :  { %v2903_v26 = vmul.f32 %v3068_v16, %v2894_v20 }
0x1559   :  { %v2913_v28 = vadd.f32 %v3069_v22, %v2904_v25 }
0x155a   :  { %v2912_v42 = vadd.f32 %v3069_v22, %v2903_v26 }
0x155b   :  { %v2917_v50 = vsub.f32 %v2911_v27, %v2913_v28 }
0x155c   :  { %v2916_v36 = vsub.f32 %v2910_v29, %v2912_v42 }
0x155d   :  { %v2919_v32 = vmul.f32 %v2917_v50, %v2915_v34 }
0x155e   :  { %v2918_v37 = vmul.f32 %v2916_v36, %v2914_v35 }
0x155f   :  { %v2921_v44 = vmul.f32 %v2919_v32, %v2919_v32 }
0x1560   :  { %v2920_v49 = vmul.f32 %v2918_v37, %v2918_v37 }
0x1561   :  { %v2923_v39 = vsel %vm393_vm0, %v2921_v44, 0.0 }
0x1562   :  { %v2922_v53 = vsel %vm393_vm0, %v2920_v49, 0.0 }
0x1563   :  { %v2924_v40 = vadd.f32 %v2923_v39, %v2922_v53 }
0x1565   :  { %2925 = vadd.xlane.f32.xlu0 %v2924_v40 }
0x15f2   :  { %v2926_v30 = vpop.xlane.xlu0 %2925 }
0x15f3   :  { %v2927_v23 = vrot.slane %v2926_v30, 4 }
0x15f5   :  { %v2928_v24 = vadd.f32 %v2927_v23, %v2926_v30 }
0x15f7   :  { %v2929_v54 = vrot.slane %v2928_v24, 2 }
0x15f9   :  { %v2930_v48 = vadd.f32 %v2929_v54, %v2928_v24 }
0x15fb   :  { %v2931_v56 = vrot.slane %v2930_v48, 1 }
0x15fd   :  { %v2932_v41 = vadd.f32 %v2931_v56, %v2930_v48 }
0x15ff   :  { %3956 = vpush %v2932_v41 }
0x1630   :  { %s3957_s2 = spop %3956 }
0x1631   :  { %s2934_s3 = smul.f32 0.00390625, %s3957_s2 }
0x1633   :  { %2936 = sst [smem:[#allocation2]] %s2934_s3 }
0x1634   :  { %4177 = shalt.err (!%p4174_p2)
}
0x1635   :  { %s4185_s15 = smov [#allocation2]  }
0x1636   :  { %2944 = dma.smem_to_hbm %s4185_s15, 16, %s5152_s8, [#allocation3]  }
0x1637   :  { %4178 = dma.done.wait [#allocation3], 16  }
0x1638   :  { %4179 = vsyncadd [#allocation3], 4294967280 }
0x1639   :  { %2948 = sfence }
0x163a   :  { %2949 = vsyncpa [#allocation3], 1 }

</bundles_post_ra>
